<compile_context>
chip_gen: v7x
topology: tpu7x:2x2x1
jax: 0.10.0
libtpu: 0.0.40
codegen_flags: <defaults>
</compile_context>

<pallas_src>
import functools
import math

import jax
import jax.numpy as jnp
import numpy as np
from jax.experimental import pallas as pl
from jax.experimental.pallas import tpu as pltpu


# ---------------------------------------------------------------------------
# compiler params — per-chip scoped-VMEM limit (v5e/v6e: 128 MiB physical,
# v7x: 64 MiB physical)
# ---------------------------------------------------------------------------

_VMEM_LIMIT_CACHE = None


def _vmem_limit_bytes():
    global _VMEM_LIMIT_CACHE
    if _VMEM_LIMIT_CACHE is None:
        try:
            cap = int(pltpu.get_tpu_info().vmem_capacity_bytes)
            _VMEM_LIMIT_CACHE = min((cap * 3) // 4, 96 * 1024 * 1024)
        except Exception:
            _VMEM_LIMIT_CACHE = 48 * 1024 * 1024     # safe on every chip
    return _VMEM_LIMIT_CACHE


def _compiler_params(semantics):
    return pltpu.CompilerParams(dimension_semantics=semantics,
                                vmem_limit_bytes=_vmem_limit_bytes())


def _pick_tile(n, cap):
    return n if n <= cap else cap


# ----------------------------- Pallas kernels -----------------------------

def _attn_ln_kernel(xq_ref, src_ref, bias_ref, wq_ref, bq_ref, wkv_ref,
                    bkv_ref, wo_ref, bo_ref, g_ref, beta_ref, o_ref, kv_sc, *,
                    num_heads, scale, causal):
    """LayerNorm(x + MHA(x, src)) for one (batch, q-tile) grid step.

    xq_ref : [1, tq, D]  query rows of x (bf16)       src_ref: [1, Lk, D]
    bias_ref: [1, {1,tq}, Lk] additive mask (f32)      kv_sc : [Lk, 2D] bf16
    weights are bf16, biases / LN params f32.
    """
    qi = pl.program_id(1)
    tq, D = xq_ref.shape[1], xq_ref.shape[2]
    Lk = src_ref.shape[1]
    Dh = D // num_heads

    # ---- hoisted KV projection: computed once per batch element (first
    # q-tile) and reused by every query tile via a persistent VMEM scratch.
    @pl.when(qi == 0)
    def _():
        src = src_ref[0].astype(jnp.bfloat16)                      # [Lk, D]
        kv = jnp.dot(src, wkv_ref[...],
                     preferred_element_type=jnp.float32) + bkv_ref[...]
        kv_sc[...] = kv.astype(kv_sc.dtype)                        # [Lk, 2D]

    x = xq_ref[0].astype(jnp.float32)                              # [tq, D]
    q = jnp.dot(x.astype(jnp.bfloat16), wq_ref[...],
                preferred_element_type=jnp.float32) + bq_ref[...]
    q = (q * scale).astype(jnp.bfloat16)      # softmax scale folded into q once
    kv = kv_sc[...]
    k, v = kv[:, :D], kv[:, D:]

    bias = bias_ref[0].astype(jnp.float32)                         # [{1,tq}, Lk]
    if causal:
        # causal part of the mask generated in-kernel (no [B,L,L] HBM tensor)
        row = qi * tq + jax.lax.broadcasted_iota(jnp.int32, (tq, Lk), 0)
        col = jax.lax.broadcasted_iota(jnp.int32, (tq, Lk), 1)
        bias = bias + jnp.where(col <= row, 0.0, -1e9).astype(jnp.float32)

    # ---- all heads: per-head scores / softmax (2-D matmuls); contexts are
    # collected and projected with ONE full-K output matmul (un-folded wo).
    ctxs = []
    for h in range(num_heads):
        sl = slice(h * Dh, (h + 1) * Dh)
        s = jax.lax.dot_general(q[:, sl], k[:, sl], (((1,), (1,)), ((), ())),
                                preferred_element_type=jnp.float32)
        s = s + bias                                               # [tq, Lk]
        s = s - jnp.max(s, axis=-1, keepdims=True)
        p = jnp.exp(s)
        p = p * pl.reciprocal(jnp.sum(p, axis=-1, keepdims=True), approx=True)
        ctxs.append(jnp.dot(p.astype(jnp.bfloat16), v[:, sl],
                            preferred_element_type=jnp.float32))   # [tq, Dh]
    ctx = jnp.concatenate(ctxs, axis=-1).astype(jnp.bfloat16)      # [tq, D]

    y = jnp.dot(ctx, wo_ref[...], preferred_element_type=jnp.float32)
    y = y + bo_ref[...] + x                        # out-proj bias + residual
    mean = jnp.mean(y, axis=-1, keepdims=True)
    var = jnp.mean((y - mean) ** 2, axis=-1, keepdims=True)
    out = (y - mean) * jax.lax.rsqrt(var + 1e-5) * g_ref[...] + beta_ref[...]
    o_ref[0] = out.astype(o_ref.dtype)


def _ffn_ln_kernel(x_ref, w1_ref, b1_ref, w2_ref, b2_ref, g_ref, beta_ref,
                   o_ref):
    """LayerNorm(x + FC2(ReLU(FC1(x)))) on a [tm, D] row tile."""
    xb = x_ref[...].astype(jnp.bfloat16)                           # [tm, D]
    x = x_ref[...].astype(jnp.float32)
    h = jnp.dot(xb, w1_ref[...], preferred_element_type=jnp.float32) + b1_ref[...]
    h = jnp.maximum(h, 0.0)
    y = jnp.dot(h.astype(jnp.bfloat16), w2_ref[...],
                preferred_element_type=jnp.float32) + b2_ref[...]
    y = y + x
    mean = jnp.mean(y, axis=-1, keepdims=True)
    var = jnp.mean((y - mean) ** 2, axis=-1, keepdims=True)
    o_ref[...] = ((y - mean) * jax.lax.rsqrt(var + 1e-5)
                  * g_ref[...] + beta_ref[...]).astype(o_ref.dtype)


def _linear_bias_kernel(x_ref, w_ref, b_ref, o_ref):
    y = jnp.dot(x_ref[...].astype(jnp.bfloat16), w_ref[...],
                preferred_element_type=jnp.float32) + b_ref[...]
    o_ref[...] = y.astype(o_ref.dtype)


# ----------------------------- kernel wrappers -----------------------------

def attn_ln_pallas(x, src, bias, ap, ln_g, ln_b, *, num_heads, causal=False,
                   q_tile=256):
    """LayerNorm(x + MHA(q=x, kv=src)).

    x: [B, Lq, D] (bf16), src: [B, Lk, D], bias: [B, {1,Lq}, Lk] additive mask.
    Self-attention: src is x.  Cross-attention: src is encoder_out.
    """
    B, L, D = x.shape
    Lk = src.shape[1]
    Bq = bias.shape[1]
    assert D % num_heads == 0
    tq = _pick_tile(L, q_tile)
    nq = pl.cdiv(L, tq)
    scale = (D // num_heads) ** (-0.5)

    if Bq == 1:
        bias_spec = pl.BlockSpec((1, 1, Lk), lambda b, q: (b, 0, 0))
    else:
        bias_spec = pl.BlockSpec((1, tq, Lk), lambda b, q: (b, q, 0))

    return pl.pallas_call(
        functools.partial(_attn_ln_kernel, num_heads=num_heads, scale=scale,
                          causal=causal),
        out_shape=jax.ShapeDtypeStruct((B, L, D), x.dtype),
        grid=(B, nq),
        in_specs=[
            pl.BlockSpec((1, tq, D), lambda b, q: (b, q, 0)),   # query rows of x
            pl.BlockSpec((1, Lk, D), lambda b, q: (b, 0, 0)),   # full KV source
            bias_spec,
            pl.BlockSpec((D, D), lambda b, q: (0, 0)),          # wq  (bf16)
            pl.BlockSpec((1, D), lambda b, q: (0, 0)),          # bq
            pl.BlockSpec((D, 2 * D), lambda b, q: (0, 0)),      # wkv (bf16)
            pl.BlockSpec((1, 2 * D), lambda b, q: (0, 0)),      # bkv
            pl.BlockSpec((D, D), lambda b, q: (0, 0)),          # wo  (bf16)
            pl.BlockSpec((1, D), lambda b, q: (0, 0)),          # bo
            pl.BlockSpec((1, D), lambda b, q: (0, 0)),          # ln gamma
            pl.BlockSpec((1, D), lambda b, q: (0, 0)),          # ln beta
        ],
        out_specs=pl.BlockSpec((1, tq, D), lambda b, q: (b, q, 0)),
        scratch_shapes=[pltpu.VMEM((Lk, 2 * D), jnp.bfloat16)],
        compiler_params=_compiler_params(("parallel", "arbitrary")),
    )(x, src, bias, ap["wq"], ap["bq"], ap["wkv"], ap["bkv"], ap["wo"],
      ap["bo"], ln_g, ln_b)


def ffn_ln_pallas(x2d, w1, b1, w2, b2, ln_g, ln_b, *, row_tile=512):
    """LayerNorm(x + FFN(x)) over [N, D] rows; weights resident across the grid."""
    N, D = x2d.shape
    Dff = w1.shape[1]
    tm = _pick_tile(N, row_tile)
    return pl.pallas_call(
        _ffn_ln_kernel,
        out_shape=jax.ShapeDtypeStruct((N, D), x2d.dtype),
        grid=(pl.cdiv(N, tm),),
        in_specs=[
            pl.BlockSpec((tm, D), lambda i: (i, 0)),
            pl.BlockSpec((D, Dff), lambda i: (0, 0)),
            pl.BlockSpec((1, Dff), lambda i: (0, 0)),
            pl.BlockSpec((Dff, D), lambda i: (0, 0)),
            pl.BlockSpec((1, D), lambda i: (0, 0)),
            pl.BlockSpec((1, D), lambda i: (0, 0)),
            pl.BlockSpec((1, D), lambda i: (0, 0)),
        ],
        out_specs=pl.BlockSpec((tm, D), lambda i: (i, 0)),
        compiler_params=_compiler_params(("parallel",)),
    )(x2d, w1, b1, w2, b2, ln_g, ln_b)


def linear_pallas(x2d, w, b, *, row_tile=256, col_tile=1024):
    """y = x @ w + b with a (rows, cols) grid; used for the vocab projection."""
    N, D = x2d.shape
    V = w.shape[1]
    tm = _pick_tile(N, row_tile)
    tn = _pick_tile(V, col_tile)
    return pl.pallas_call(
        _linear_bias_kernel,
        out_shape=jax.ShapeDtypeStruct((N, V), jnp.float32),
        grid=(pl.cdiv(N, tm), pl.cdiv(V, tn)),
        in_specs=[
            pl.BlockSpec((tm, D), lambda i, j: (i, 0)),
            pl.BlockSpec((D, tn), lambda i, j: (0, j)),
            pl.BlockSpec((1, tn), lambda i, j: (0, j)),
        ],
        out_specs=pl.BlockSpec((tm, tn), lambda i, j: (i, j)),
        compiler_params=_compiler_params(("parallel", "parallel")),
    )(x2d, w, b)


# ----------------------------- model wiring --------------------------------

def sinusoid_encoding_table(max_len, d_model, padding_idx=None):
    pos = jnp.arange(max_len, dtype=jnp.float32)[:, None]
    dim = jnp.arange(d_model // 2, dtype=jnp.float32)[None, :]
    angle = pos / (10000.0 ** (2.0 * dim / d_model))
    out = jnp.zeros((max_len, d_model), jnp.float32)
    out = out.at[:, ::2].set(jnp.sin(angle))
    out = out.at[:, 1::2].set(jnp.cos(angle))
    if padding_idx is not None:
        out = out.at[padding_idx].set(0.0)
    return out


def prepare_params(params):
    """Fuse KV weights, cast matmul weights to bf16 (one-time prep).

    Biases, LayerNorm params and embeddings stay f32 (accumulation / LN in f32).
    """
    def prep_attn(a):
        return {
            "wq": a["wq"].astype(jnp.bfloat16),
            "bq": a["bq"].reshape(1, -1),
            "wkv": jnp.concatenate([a["wk"], a["wv"]],
                                   axis=1).astype(jnp.bfloat16),
            "bkv": jnp.concatenate([a["bk"], a["bv"]], axis=0).reshape(1, -1),
            "wo": a["wo"].astype(jnp.bfloat16),
            "bo": a["bo"].reshape(1, -1),
        }

    prep = {
        "word_embed": params["word_embed"],
        "pos_table": params["pos_table"],
        "gen_w": params["gen_w"].astype(jnp.bfloat16),
        "gen_b": params["gen_b"].reshape(1, -1),
        "layers": [],
    }
    for lp in params["layers"]:
        prep["layers"].append({
            "word_attn": prep_attn(lp["word_attn"]),
            "cross_att": prep_attn(lp["cross_att"]),
            "ff_w1": lp["ff_w1"].astype(jnp.bfloat16),
            "ff_b1": lp["ff_b1"].reshape(1, -1),
            "ff_w2": lp["ff_w2"].astype(jnp.bfloat16),
            "ff_b2": lp["ff_b2"].reshape(1, -1),
            "ln1_g": lp["ln1_g"].reshape(1, -1), "ln1_b": lp["ln1_b"].reshape(1, -1),
            "ln2_g": lp["ln2_g"].reshape(1, -1), "ln2_b": lp["ln2_b"].reshape(1, -1),
            "ln3_g": lp["ln3_g"].reshape(1, -1), "ln3_b": lp["ln3_b"].reshape(1, -1),
        })
    return prep


def decoder_forward(prep, seq, encoder_out, seq_mask=None, att_mask=None,
                    num_heads=4, causal=False):
    """Full-sequence decoder forward.

    If causal=True the causal part of the self-attention mask is generated
    in-kernel; seq_mask (if given) is then only the padding component
    ([B, L] or [B, 1, L]).  If causal=False a full [B, L, L] seq_mask is used
    exactly as in the PyTorch module.
    """
    B, L = seq.shape
    M = encoder_out.shape[1]
    D = prep["word_embed"].shape[1]
    assert prep["pos_table"].shape[0] >= L + 1, "pos_table too short for seq"

    # embeddings (gather is glue; stays in JAX).  Residual stream is bf16
    # between kernels (halves HBM traffic); LN / accumulation stay f32 inside.
    x = math.sqrt(D) * jnp.take(prep["word_embed"], seq, axis=0)
    x = x + prep["pos_table"][1:L + 1][None, :, :]      # torch.arange(1, L+1)
    x = x.astype(jnp.bfloat16)
    enc = encoder_out.astype(jnp.bfloat16)

    # additive attention biases (0 keep / -1e9 mask)
    if seq_mask is not None:
        sm = seq_mask if seq_mask.ndim == 3 else seq_mask.reshape(B, 1, L)
        bias_self = jnp.where(sm == 0, -1e9, 0.0).astype(jnp.float32)
    else:
        bias_self = jnp.zeros((B, 1, L), jnp.float32)
    if att_mask is not None:
        bias_cross = jnp.where(att_mask.reshape(B, 1, M) == 0,
                               -1e9, 0.0).astype(jnp.float32)
    else:
        bias_cross = jnp.zeros((B, 1, M), jnp.float32)

    for lp in prep["layers"]:
        x = attn_ln_pallas(x, x, bias_self, lp["word_attn"],
                           lp["ln1_g"], lp["ln1_b"],
                           num_heads=num_heads, causal=causal)
        x = attn_ln_pallas(x, enc, bias_cross, lp["cross_att"],
                           lp["ln2_g"], lp["ln2_b"],
                           num_heads=num_heads, causal=False)
        x = ffn_ln_pallas(x.reshape(B * L, D), lp["ff_w1"], lp["ff_b1"],
                          lp["ff_w2"], lp["ff_b2"], lp["ln3_g"],
                          lp["ln3_b"]).reshape(B, L, D)

    # TODO(synk): dropout layers are identity (inference mode).
    logits = linear_pallas(x.reshape(B * L, D), prep["gen_w"], prep["gen_b"])
    return logits.reshape(B, L, -1)


# --------------------------- pure-JAX reference ----------------------------
# Exact f32 semantics of the original PyTorch module (no bf16 casts).

def _ref_mhsa(p, q, k, v, bias, num_heads):
    B, Nq, D = q.shape
    Nk = k.shape[1]
    Dh = D // num_heads
    scale = Dh ** (-0.5)
    qp = (q.reshape(B * Nq, D) @ p["wq"] + p["bq"]).reshape(B, Nq, num_heads, Dh).transpose(0, 2, 1, 3)
    kp = (k.reshape(B * Nk, D) @ p["wk"] + p["bk"]).reshape(B, Nk, num_heads, Dh).transpose(0, 2, 1, 3)
    vp = (v.reshape(B * Nk, D) @ p["wv"] + p["bv"]).reshape(B, Nk, num_heads, Dh).transpose(0, 2, 1, 3)
    s = jnp.einsum("bhqd,bhkd->bhqk", qp, kp) * scale + bias[:, None, :, :]
    a = jax.nn.softmax(s, axis=-1)
    o = jnp.einsum("bhqk,bhkd->bhqd", a, vp).transpose(0, 2, 1, 3).reshape(B * Nq, D)
    return (o @ p["wo"] + p["bo"]).reshape(B, Nq, D)


def _ref_ln(x, g, b):
    mean = jnp.mean(x, axis=-1, keepdims=True)
    var = jnp.mean((x - mean) ** 2, axis=-1, keepdims=True)
    return (x - mean) * jax.lax.rsqrt(var + 1e-5) * g + b


def decoder_forward_ref(params, seq, encoder_out, seq_mask, att_mask, num_heads):
    B, L = seq.shape
    M = encoder_out.shape[1]
    D = params["word_embed"].shape[1]
    x = math.sqrt(D) * params["word_embed"][seq] + \
        params["pos_table"][jnp.arange(1, L + 1)][None]
    bias_self = jnp.where(seq_mask == 0, -1e9, 0.0).astype(jnp.float32)
    bias_cross = jnp.broadcast_to(
        jnp.where(att_mask.reshape(B, 1, M) == 0, -1e9, 0.0), (B, L, M)).astype(jnp.float32)
    for p in params["layers"]:
        sc = x
        x = _ref_ln(_ref_mhsa(p["word_attn"], x, x, x, bias_self, num_heads) + sc,
                    p["ln1_g"], p["ln1_b"])
        sc = x
        x = _ref_ln(_ref_mhsa(p["cross_att"], x, encoder_out, encoder_out,
                              bias_cross, num_heads) + sc, p["ln2_g"], p["ln2_b"])
        sc = x
        h = jnp.maximum(x.reshape(B * L, D) @ p["ff_w1"] + p["ff_b1"], 0.0)
        h = (h @ p["ff_w2"] + p["ff_b2"]).reshape(B, L, D)
        x = _ref_ln(h + sc, p["ln3_g"], p["ln3_b"])
    return (x.reshape(B * L, D) @ params["gen_w"] + params["gen_b"]).reshape(B, L, -1)


# ------------------------------- param init --------------------------------

def _init_linear(key, din, dout):
    k1, k2 = jax.random.split(key)
    w = jax.random.normal(k1, (din, dout), jnp.float32) / math.sqrt(din)
    b = 0.01 * jax.random.normal(k2, (dout,), jnp.float32)
    return w, b


def _init_attn(key, D):
    ks = jax.random.split(key, 4)
    p = {}
    for name, k in zip(["q", "k", "v", "o"], ks):
        w, b = _init_linear(k, D, D)
        p["w" + name], p["b" + name] = w, b
    return p


def init_params(key, vocab_size, embed_dim, depth, max_len=100):
    D = embed_dim
    keys = jax.random.split(key, 3 + depth)
    params = {
        "word_embed": jax.random.normal(keys[0], (vocab_size, D), jnp.float32) * 0.1,
        "pos_table": sinusoid_encoding_table(max_len, D, padding_idx=0),
        "layers": [],
    }
    gw, gb = _init_linear(keys[1], D, vocab_size)
    params["gen_w"], params["gen_b"] = gw, gb
    for i in range(depth):
        lk = jax.random.split(keys[3 + i], 4)
        w1, b1 = _init_linear(lk[2], D, 4 * D)
        w2, b2 = _init_linear(lk[3], 4 * D, D)
        params["layers"].append({
            "word_attn": _init_attn(lk[0], D),
            "cross_att": _init_attn(lk[1], D),
            "ff_w1": w1, "ff_b1": b1, "ff_w2": w2, "ff_b2": b2,
            "ln1_g": jnp.ones((D,), jnp.float32), "ln1_b": jnp.zeros((D,), jnp.float32),
            "ln2_g": jnp.ones((D,), jnp.float32), "ln2_b": jnp.zeros((D,), jnp.float32),
            "ln3_g": jnp.ones((D,), jnp.float32), "ln3_b": jnp.zeros((D,), jnp.float32),
        })
    return params


# ----------------------------------- main -----------------------------------

if __name__ == "__main__":
    B, L, M, D, H, depth, vocab = 2, 8, 10, 32, 4, 3, 50

    root = jax.random.PRNGKey(0)
    kp, ks, ke, km = jax.random.split(root, 4)

    params = init_params(kp, vocab, D, depth)
    prep = prepare_params(params)            # fused + bf16 weights for kernels

    seq = jax.random.randint(ks, (B, L), 1, vocab).astype(jnp.int32)
    encoder_out = jax.random.normal(ke, (B, M, D), jnp.float32)
    # cross-attention mask [B, M] (mask out the last two encoder tokens of batch 1)
    att_mask = jnp.ones((B, M), jnp.int32).at[1, M - 2:].set(0)

    # kernel path: causal self-attention mask generated in-kernel (no [B,L,L]
    # mask tensor in HBM); padding component of the self mask is all-ones here.
    out = decoder_forward(prep, seq, encoder_out, seq_mask=None,
                          att_mask=att_mask, num_heads=H, causal=True)
    out = jax.block_until_ready(out)
    assert out.shape == (B, L, vocab), out.shape

    # Reference keeps the exact f32 semantics of the PyTorch module (explicit
    # causal [B,L,L] mask).  Kernel path uses bf16 MXU operands and a bf16
    # residual stream (f32 accumulation / LayerNorm), hence the loosened tol.
    seq_mask_full = jnp.broadcast_to(jnp.tril(jnp.ones((L, L), jnp.int32)),
                                     (B, L, L))
    ref = decoder_forward_ref(params, seq, encoder_out, seq_mask_full,
                              att_mask, H)
    np.testing.assert_allclose(np.asarray(out), np.asarray(ref),
                               rtol=4e-2, atol=4e-2)

    print("KERNEL_OK")
</pallas_src>

<mosaic_0001>
module attributes {stable_mosaic.version = 11 : i64} {
  func.func @_attn_ln_kernel(%arg0: i32, %arg1: i32, %arg2: memref<1x8x32xbf16, #tpu.memory_space<vmem>>, %arg3: memref<1x8x32xbf16, #tpu.memory_space<vmem>>, %arg4: memref<1x1x8xf32, #tpu.memory_space<vmem>>, %arg5: memref<32x32xbf16, #tpu.memory_space<vmem>>, %arg6: memref<1x32xf32, #tpu.memory_space<vmem>>, %arg7: memref<32x64xbf16, #tpu.memory_space<vmem>>, %arg8: memref<1x64xf32, #tpu.memory_space<vmem>>, %arg9: memref<32x32xbf16, #tpu.memory_space<vmem>>, %arg10: memref<1x32xf32, #tpu.memory_space<vmem>>, %arg11: memref<1x32xf32, #tpu.memory_space<vmem>>, %arg12: memref<1x32xf32, #tpu.memory_space<vmem>>, %arg13: memref<1x8x32xbf16, #tpu.memory_space<vmem>>, %arg14: memref<8x64xbf16, #tpu.memory_space<vmem>>) attributes {dimension_semantics = [#tpu.dimension_semantics<parallel>, #tpu.dimension_semantics<arbitrary>], iteration_bounds = array<i64: 2, 1>, scalar_prefetch = 0 : i64, scratch_operands = 1 : i64, tpu.core_type = #tpu.core_type<tc>, window_params = [{transform_indices = @transform_0, window_bounds = array<i64: 1, 8, 32>}, {transform_indices = @transform_1, window_bounds = array<i64: 1, 8, 32>}, {transform_indices = @transform_2, window_bounds = array<i64: 1, 1, 8>}, {pipeline_mode = #tpu.pipeline_mode<synchronous>, transform_indices = @transform_3, window_bounds = array<i64: 32, 32>}, {pipeline_mode = #tpu.pipeline_mode<synchronous>, transform_indices = @transform_4, window_bounds = array<i64: 1, 32>}, {pipeline_mode = #tpu.pipeline_mode<synchronous>, transform_indices = @transform_5, window_bounds = array<i64: 32, 64>}, {pipeline_mode = #tpu.pipeline_mode<synchronous>, transform_indices = @transform_6, window_bounds = array<i64: 1, 64>}, {pipeline_mode = #tpu.pipeline_mode<synchronous>, transform_indices = @transform_7, window_bounds = array<i64: 32, 32>}, {pipeline_mode = #tpu.pipeline_mode<synchronous>, transform_indices = @transform_8, window_bounds = array<i64: 1, 32>}, {pipeline_mode = #tpu.pipeline_mode<synchronous>, transform_indices = @transform_9, window_bounds = array<i64: 1, 32>}, {pipeline_mode = #tpu.pipeline_mode<synchronous>, transform_indices = @transform_10, window_bounds = array<i64: 1, 32>}, {transform_indices = @transform_11, window_bounds = array<i64: 1, 8, 32>}]} {
    %c0_i32 = arith.constant 0 : i32
    %0 = arith.cmpi eq, %arg1, %c0_i32 : i32
    %1 = arith.extui %0 : i1 to i32
    %c0_i32_0 = arith.constant 0 : i32
    %2 = arith.cmpi ne, %1, %c0_i32_0 : i32
    scf.if %2 {
      %c0_48 = arith.constant 0 : index
      %c0_49 = arith.constant 0 : index
      %c0_50 = arith.constant 0 : index
      %135 = vector.load %arg3[%c0_48, %c0_49, %c0_50] : memref<1x8x32xbf16, #tpu.memory_space<vmem>>, vector<1x8x32xbf16>
      %136 = vector.shape_cast %135 : vector<1x8x32xbf16> to vector<8x32xbf16>
      %c0_51 = arith.constant 0 : index
      %c0_52 = arith.constant 0 : index
      %137 = vector.load %arg7[%c0_51, %c0_52] : memref<32x64xbf16, #tpu.memory_space<vmem>>, vector<32x64xbf16>
      %cst_53 = arith.constant dense<0.000000e+00> : vector<8x64xf32>
      %138 = tpu.matmul %136, %137, %cst_53 {dimension_numbers = #tpu.dot_dimension_numbers<[1], [0], [0], [1], [0, 0, 1, 1], [], []>} : vector<8x32xbf16>, vector<32x64xbf16>, vector<8x64xf32> -> vector<8x64xf32>
      %c0_54 = arith.constant 0 : index
      %c0_55 = arith.constant 0 : index
      %139 = vector.load %arg8[%c0_54, %c0_55] : memref<1x64xf32, #tpu.memory_space<vmem>>, vector<1x64xf32>
      %140 = vector.broadcast %139 : vector<1x64xf32> to vector<8x64xf32>
      %141 = arith.addf %138, %140 : vector<8x64xf32>
      %142 = arith.truncf %141 : vector<8x64xf32> to vector<8x64xbf16>
      %c0_56 = arith.constant 0 : index
      %c0_57 = arith.constant 0 : index
      %143 = vector.load %arg14[%c0_56, %c0_57] : memref<8x64xbf16, #tpu.memory_space<vmem>>, vector<8x64xbf16>
      tpu.vector_store %arg14[%c0_56, %c0_57], %142 {strides = array<i32>} : memref<8x64xbf16, #tpu.memory_space<vmem>>, vector<8x64xbf16>,
    } else {
    }
    %c0 = arith.constant 0 : index
    %c0_1 = arith.constant 0 : index
    %c0_2 = arith.constant 0 : index
    %3 = vector.load %arg2[%c0, %c0_1, %c0_2] : memref<1x8x32xbf16, #tpu.memory_space<vmem>>, vector<1x8x32xbf16>
    %4 = vector.shape_cast %3 : vector<1x8x32xbf16> to vector<8x32xbf16>
    %5 = arith.extf %4 : vector<8x32xbf16> to vector<8x32xf32>
    %6 = arith.truncf %5 : vector<8x32xf32> to vector<8x32xbf16>
    %c0_3 = arith.constant 0 : index
    %c0_4 = arith.constant 0 : index
    %7 = vector.load %arg5[%c0_3, %c0_4] : memref<32x32xbf16, #tpu.memory_space<vmem>>, vector<32x32xbf16>
    %cst = arith.constant dense<0.000000e+00> : vector<8x32xf32>
    %8 = tpu.matmul %6, %7, %cst {dimension_numbers = #tpu.dot_dimension_numbers<[1], [0], [0], [1], [0, 0, 1, 1], [], []>} : vector<8x32xbf16>, vector<32x32xbf16>, vector<8x32xf32> -> vector<8x32xf32>
    %c0_5 = arith.constant 0 : index
    %c0_6 = arith.constant 0 : index
    %9 = vector.load %arg6[%c0_5, %c0_6] : memref<1x32xf32, #tpu.memory_space<vmem>>, vector<1x32xf32>
    %10 = vector.broadcast %9 : vector<1x32xf32> to vector<8x32xf32>
    %11 = arith.addf %8, %10 : vector<8x32xf32>
    %cst_7 = arith.constant 0.353553385 : f32
    %12 = vector.broadcast %cst_7 : f32 to vector<8x32xf32>
    %13 = arith.mulf %11, %12 : vector<8x32xf32>
    %14 = arith.truncf %13 : vector<8x32xf32> to vector<8x32xbf16>
    %c0_8 = arith.constant 0 : index
    %c0_9 = arith.constant 0 : index
    %15 = vector.load %arg14[%c0_8, %c0_9] : memref<8x64xbf16, #tpu.memory_space<vmem>>, vector<8x64xbf16>
    %16 = vector.extract_strided_slice %15 {offsets = [0, 0], sizes = [8, 32], strides = [1, 1]} : vector<8x64xbf16> to vector<8x32xbf16>
    %17 = vector.extract_strided_slice %15 {offsets = [0, 32], sizes = [8, 32], strides = [1, 1]} : vector<8x64xbf16> to vector<8x32xbf16>
    %c0_10 = arith.constant 0 : index
    %c0_11 = arith.constant 0 : index
    %c0_12 = arith.constant 0 : index
    %18 = vector.load %arg4[%c0_10, %c0_11, %c0_12] : memref<1x1x8xf32, #tpu.memory_space<vmem>>, vector<1x1x8xf32>
    %19 = vector.shape_cast %18 : vector<1x1x8xf32> to vector<1x8xf32>
    %c8_i32 = arith.constant 8 : i32
    %20 = arith.muli %arg1, %c8_i32 : i32
    %21 = tpu.iota {dimensions = array<i32: 0>} : vector<8x8xi32>
    %22 = vector.broadcast %20 : i32 to vector<8x8xi32>
    %23 = arith.addi %22, %21 : vector<8x8xi32>
    %24 = tpu.iota {dimensions = array<i32: 1>} : vector<8x8xi32>
    %25 = arith.cmpi sle, %24, %23 : vector<8x8xi32>
    %cst_13 = arith.constant 0.000000e+00 : f32
    %cst_14 = arith.constant -1.000000e+09 : f32
    %26 = vector.broadcast %cst_13 : f32 to vector<8x8xf32>
    %27 = vector.broadcast %cst_14 : f32 to vector<8x8xf32>
    %28 = arith.select %25, %26, %27 : vector<8x8xi1>, vector<8x8xf32>
    %29 = vector.broadcast %19 : vector<1x8xf32> to vector<8x8xf32>
    %30 = arith.addf %29, %28 : vector<8x8xf32>
    %31 = vector.extract_strided_slice %14 {offsets = [0, 0], sizes = [8, 8], strides = [1, 1]} : vector<8x32xbf16> to vector<8x8xbf16>
    %32 = vector.extract_strided_slice %16 {offsets = [0, 0], sizes = [8, 8], strides = [1, 1]} : vector<8x32xbf16> to vector<8x8xbf16>
    %cst_15 = arith.constant dense<0.000000e+00> : vector<8x8xf32>
    %33 = tpu.matmul %31, %32, %cst_15 {dimension_numbers = #tpu.dot_dimension_numbers<[1], [1], [0], [0], [0, 0, 1, 0], [], []>} : vector<8x8xbf16>, vector<8x8xbf16>, vector<8x8xf32> -> vector<8x8xf32>
    %34 = arith.addf %33, %30 : vector<8x8xf32>
    %cst_16 = arith.constant dense<0xFF800000> : vector<8xf32>
    %35 = vector.multi_reduction <maximumf>, %34, %cst_16 [1] : vector<8x8xf32> to vector<8xf32>
    %36 = vector.shape_cast %35 : vector<8xf32> to vector<8x1xf32>
    %37 = vector.broadcast %36 : vector<8x1xf32> to vector<8x8xf32>
    %38 = arith.subf %34, %37 : vector<8x8xf32>
    %39 = math.exp %38 : vector<8x8xf32>
    %cst_17 = arith.constant dense<0.000000e+00> : vector<8xf32>
    %40 = vector.multi_reduction <add>, %39, %cst_17 [1] : vector<8x8xf32> to vector<8xf32>
    %41 = vector.shape_cast %40 : vector<8xf32> to vector<8x1xf32>
    %42 = tpu.reciprocal %41 {approx = true} : vector<8x1xf32> -> vector<8x1xf32>
    %43 = vector.broadcast %42 : vector<8x1xf32> to vector<8x8xf32>
    %44 = arith.mulf %39, %43 : vector<8x8xf32>
    %45 = arith.truncf %44 : vector<8x8xf32> to vector<8x8xbf16>
    %46 = vector.extract_strided_slice %17 {offsets = [0, 0], sizes = [8, 8], strides = [1, 1]} : vector<8x32xbf16> to vector<8x8xbf16>
    %cst_18 = arith.constant dense<0.000000e+00> : vector<8x8xf32>
    %47 = tpu.matmul %45, %46, %cst_18 {dimension_numbers = #tpu.dot_dimension_numbers<[1], [0], [0], [1], [0, 0, 1, 1], [], []>} : vector<8x8xbf16>, vector<8x8xbf16>, vector<8x8xf32> -> vector<8x8xf32>
    %48 = vector.extract_strided_slice %14 {offsets = [0, 8], sizes = [8, 8], strides = [1, 1]} : vector<8x32xbf16> to vector<8x8xbf16>
    %49 = vector.extract_strided_slice %16 {offsets = [0, 8], sizes = [8, 8], strides = [1, 1]} : vector<8x32xbf16> to vector<8x8xbf16>
    %cst_19 = arith.constant dense<0.000000e+00> : vector<8x8xf32>
    %50 = tpu.matmul %48, %49, %cst_19 {dimension_numbers = #tpu.dot_dimension_numbers<[1], [1], [0], [0], [0, 0, 1, 0], [], []>} : vector<8x8xbf16>, vector<8x8xbf16>, vector<8x8xf32> -> vector<8x8xf32>
    %51 = arith.addf %50, %30 : vector<8x8xf32>
    %cst_20 = arith.constant dense<0xFF800000> : vector<8xf32>
    %52 = vector.multi_reduction <maximumf>, %51, %cst_20 [1] : vector<8x8xf32> to vector<8xf32>
    %53 = vector.shape_cast %52 : vector<8xf32> to vector<8x1xf32>
    %54 = vector.broadcast %53 : vector<8x1xf32> to vector<8x8xf32>
    %55 = arith.subf %51, %54 : vector<8x8xf32>
    %56 = math.exp %55 : vector<8x8xf32>
    %cst_21 = arith.constant dense<0.000000e+00> : vector<8xf32>
    %57 = vector.multi_reduction <add>, %56, %cst_21 [1] : vector<8x8xf32> to vector<8xf32>
    %58 = vector.shape_cast %57 : vector<8xf32> to vector<8x1xf32>
    %59 = tpu.reciprocal %58 {approx = true} : vector<8x1xf32> -> vector<8x1xf32>
    %60 = vector.broadcast %59 : vector<8x1xf32> to vector<8x8xf32>
    %61 = arith.mulf %56, %60 : vector<8x8xf32>
    %62 = arith.truncf %61 : vector<8x8xf32> to vector<8x8xbf16>
    %63 = vector.extract_strided_slice %17 {offsets = [0, 8], sizes = [8, 8], strides = [1, 1]} : vector<8x32xbf16> to vector<8x8xbf16>
    %cst_22 = arith.constant dense<0.000000e+00> : vector<8x8xf32>
    %64 = tpu.matmul %62, %63, %cst_22 {dimension_numbers = #tpu.dot_dimension_numbers<[1], [0], [0], [1], [0, 0, 1, 1], [], []>} : vector<8x8xbf16>, vector<8x8xbf16>, vector<8x8xf32> -> vector<8x8xf32>
    %65 = vector.extract_strided_slice %14 {offsets = [0, 16], sizes = [8, 8], strides = [1, 1]} : vector<8x32xbf16> to vector<8x8xbf16>
    %66 = vector.extract_strided_slice %16 {offsets = [0, 16], sizes = [8, 8], strides = [1, 1]} : vector<8x32xbf16> to vector<8x8xbf16>
    %cst_23 = arith.constant dense<0.000000e+00> : vector<8x8xf32>
    %67 = tpu.matmul %65, %66, %cst_23 {dimension_numbers = #tpu.dot_dimension_numbers<[1], [1], [0], [0], [0, 0, 1, 0], [], []>} : vector<8x8xbf16>, vector<8x8xbf16>, vector<8x8xf32> -> vector<8x8xf32>
    %68 = arith.addf %67, %30 : vector<8x8xf32>
    %cst_24 = arith.constant dense<0xFF800000> : vector<8xf32>
    %69 = vector.multi_reduction <maximumf>, %68, %cst_24 [1] : vector<8x8xf32> to vector<8xf32>
    %70 = vector.shape_cast %69 : vector<8xf32> to vector<8x1xf32>
    %71 = vector.broadcast %70 : vector<8x1xf32> to vector<8x8xf32>
    %72 = arith.subf %68, %71 : vector<8x8xf32>
    %73 = math.exp %72 : vector<8x8xf32>
    %cst_25 = arith.constant dense<0.000000e+00> : vector<8xf32>
    %74 = vector.multi_reduction <add>, %73, %cst_25 [1] : vector<8x8xf32> to vector<8xf32>
    %75 = vector.shape_cast %74 : vector<8xf32> to vector<8x1xf32>
    %76 = tpu.reciprocal %75 {approx = true} : vector<8x1xf32> -> vector<8x1xf32>
    %77 = vector.broadcast %76 : vector<8x1xf32> to vector<8x8xf32>
    %78 = arith.mulf %73, %77 : vector<8x8xf32>
    %79 = arith.truncf %78 : vector<8x8xf32> to vector<8x8xbf16>
    %80 = vector.extract_strided_slice %17 {offsets = [0, 16], sizes = [8, 8], strides = [1, 1]} : vector<8x32xbf16> to vector<8x8xbf16>
    %cst_26 = arith.constant dense<0.000000e+00> : vector<8x8xf32>
    %81 = tpu.matmul %79, %80, %cst_26 {dimension_numbers = #tpu.dot_dimension_numbers<[1], [0], [0], [1], [0, 0, 1, 1], [], []>} : vector<8x8xbf16>, vector<8x8xbf16>, vector<8x8xf32> -> vector<8x8xf32>
    %82 = vector.extract_strided_slice %14 {offsets = [0, 24], sizes = [8, 8], strides = [1, 1]} : vector<8x32xbf16> to vector<8x8xbf16>
    %83 = vector.extract_strided_slice %16 {offsets = [0, 24], sizes = [8, 8], strides = [1, 1]} : vector<8x32xbf16> to vector<8x8xbf16>
    %cst_27 = arith.constant dense<0.000000e+00> : vector<8x8xf32>
    %84 = tpu.matmul %82, %83, %cst_27 {dimension_numbers = #tpu.dot_dimension_numbers<[1], [1], [0], [0], [0, 0, 1, 0], [], []>} : vector<8x8xbf16>, vector<8x8xbf16>, vector<8x8xf32> -> vector<8x8xf32>
    %85 = arith.addf %84, %30 : vector<8x8xf32>
    %cst_28 = arith.constant dense<0xFF800000> : vector<8xf32>
    %86 = vector.multi_reduction <maximumf>, %85, %cst_28 [1] : vector<8x8xf32> to vector<8xf32>
    %87 = vector.shape_cast %86 : vector<8xf32> to vector<8x1xf32>
    %88 = vector.broadcast %87 : vector<8x1xf32> to vector<8x8xf32>
    %89 = arith.subf %85, %88 : vector<8x8xf32>
    %90 = math.exp %89 : vector<8x8xf32>
    %cst_29 = arith.constant dense<0.000000e+00> : vector<8xf32>
    %91 = vector.multi_reduction <add>, %90, %cst_29 [1] : vector<8x8xf32> to vector<8xf32>
    %92 = vector.shape_cast %91 : vector<8xf32> to vector<8x1xf32>
    %93 = tpu.reciprocal %92 {approx = true} : vector<8x1xf32> -> vector<8x1xf32>
    %94 = vector.broadcast %93 : vector<8x1xf32> to vector<8x8xf32>
    %95 = arith.mulf %90, %94 : vector<8x8xf32>
    %96 = arith.truncf %95 : vector<8x8xf32> to vector<8x8xbf16>
    %97 = vector.extract_strided_slice %17 {offsets = [0, 24], sizes = [8, 8], strides = [1, 1]} : vector<8x32xbf16> to vector<8x8xbf16>
    %cst_30 = arith.constant dense<0.000000e+00> : vector<8x8xf32>
    %98 = tpu.matmul %96, %97, %cst_30 {dimension_numbers = #tpu.dot_dimension_numbers<[1], [0], [0], [1], [0, 0, 1, 1], [], []>} : vector<8x8xbf16>, vector<8x8xbf16>, vector<8x8xf32> -> vector<8x8xf32>
    %99 = tpu.concatenate %47, %64, %81, %98 in 1 : vector<8x8xf32>, vector<8x8xf32>, vector<8x8xf32>, vector<8x8xf32> -> vector<8x32xf32>
    %100 = arith.truncf %99 : vector<8x32xf32> to vector<8x32xbf16>
    %c0_31 = arith.constant 0 : index
    %c0_32 = arith.constant 0 : index
    %101 = vector.load %arg9[%c0_31, %c0_32] : memref<32x32xbf16, #tpu.memory_space<vmem>>, vector<32x32xbf16>
    %cst_33 = arith.constant dense<0.000000e+00> : vector<8x32xf32>
    %102 = tpu.matmul %100, %101, %cst_33 {dimension_numbers = #tpu.dot_dimension_numbers<[1], [0], [0], [1], [0, 0, 1, 1], [], []>} : vector<8x32xbf16>, vector<32x32xbf16>, vector<8x32xf32> -> vector<8x32xf32>
    %c0_34 = arith.constant 0 : index
    %c0_35 = arith.constant 0 : index
    %103 = vector.load %arg10[%c0_34, %c0_35] : memref<1x32xf32, #tpu.memory_space<vmem>>, vector<1x32xf32>
    %104 = vector.broadcast %103 : vector<1x32xf32> to vector<8x32xf32>
    %105 = arith.addf %102, %104 : vector<8x32xf32>
    %106 = arith.addf %105, %5 : vector<8x32xf32>
    %cst_36 = arith.constant dense<0.000000e+00> : vector<8xf32>
    %107 = vector.multi_reduction <add>, %106, %cst_36 [1] : vector<8x32xf32> to vector<8xf32>
    %108 = vector.shape_cast %107 : vector<8xf32> to vector<8x1xf32>
    %cst_37 = arith.constant 3.200000e+01 : f32
    %109 = vector.broadcast %cst_37 : f32 to vector<8x1xf32>
    %110 = arith.divf %108, %109 : vector<8x1xf32>
    %111 = vector.broadcast %110 : vector<8x1xf32> to vector<8x32xf32>
    %112 = arith.subf %106, %111 : vector<8x32xf32>
    %113 = arith.mulf %112, %112 : vector<8x32xf32>
    %cst_38 = arith.constant dense<0.000000e+00> : vector<8xf32>
    %114 = vector.multi_reduction <add>, %113, %cst_38 [1] : vector<8x32xf32> to vector<8xf32>
    %115 = vector.shape_cast %114 : vector<8xf32> to vector<8x1xf32>
    %cst_39 = arith.constant 3.200000e+01 : f32
    %116 = vector.broadcast %cst_39 : f32 to vector<8x1xf32>
    %117 = arith.divf %115, %116 : vector<8x1xf32>
    %118 = vector.broadcast %110 : vector<8x1xf32> to vector<8x32xf32>
    %119 = arith.subf %106, %118 : vector<8x32xf32>
    %cst_40 = arith.constant 9.99999974E-6 : f32
    %120 = vector.broadcast %cst_40 : f32 to vector<8x1xf32>
    %121 = arith.addf %117, %120 : vector<8x1xf32>
    %122 = math.rsqrt %121 : vector<8x1xf32>
    %123 = vector.broadcast %122 : vector<8x1xf32> to vector<8x32xf32>
    %124 = arith.mulf %119, %123 : vector<8x32xf32>
    %c0_41 = arith.constant 0 : index
    %c0_42 = arith.constant 0 : index
    %125 = vector.load %arg11[%c0_41, %c0_42] : memref<1x32xf32, #tpu.memory_space<vmem>>, vector<1x32xf32>
    %126 = vector.broadcast %125 : vector<1x32xf32> to vector<8x32xf32>
    %127 = arith.mulf %124, %126 : vector<8x32xf32>
    %c0_43 = arith.constant 0 : index
    %c0_44 = arith.constant 0 : index
    %128 = vector.load %arg12[%c0_43, %c0_44] : memref<1x32xf32, #tpu.memory_space<vmem>>, vector<1x32xf32>
    %129 = vector.broadcast %128 : vector<1x32xf32> to vector<8x32xf32>
    %130 = arith.addf %127, %129 : vector<8x32xf32>
    %131 = arith.truncf %130 : vector<8x32xf32> to vector<8x32xbf16>
    %c0_45 = arith.constant 0 : index
    %c0_46 = arith.constant 0 : index
    %c0_47 = arith.constant 0 : index
    %132 = vector.load %arg13[%c0_45, %c0_46, %c0_47] : memref<1x8x32xbf16, #tpu.memory_space<vmem>>, vector<1x8x32xbf16>
    %133 = vector.shape_cast %132 : vector<1x8x32xbf16> to vector<8x32xbf16>
    %134 = vector.shape_cast %131 : vector<8x32xbf16> to vector<1x8x32xbf16>
    tpu.vector_store %arg13[%c0_45, %c0_46, %c0_47], %134 {strides = array<i32>} : memref<1x8x32xbf16, #tpu.memory_space<vmem>>, vector<1x8x32xbf16>,
    return
  }
  func.func @transform_0(%arg0: i32, %arg1: i32) -> (i32, i32, i32) {
    %c0_i32 = arith.constant 0 : i32
    %c0_i32_0 = arith.constant 0 : i32
    return %arg0, %arg1, %c0_i32 : i32, i32, i32
  }
  func.func @transform_1(%arg0: i32, %arg1: i32) -> (i32, i32, i32) {
    %c0_i32 = arith.constant 0 : i32
    %c0_i32_0 = arith.constant 0 : i32
    %c0_i32_1 = arith.constant 0 : i32
    return %arg0, %c0_i32, %c0_i32_0 : i32, i32, i32
  }
  func.func @transform_2(%arg0: i32, %arg1: i32) -> (i32, i32, i32) {
    %c0_i32 = arith.constant 0 : i32
    %c0_i32_0 = arith.constant 0 : i32
    %c0_i32_1 = arith.constant 0 : i32
    return %arg0, %c0_i32, %c0_i32_0 : i32, i32, i32
  }
  func.func @transform_3(%arg0: i32, %arg1: i32) -> (i32, i32) {
    %c0_i32 = arith.constant 0 : i32
    %c0_i32_0 = arith.constant 0 : i32
    %c0_i32_1 = arith.constant 0 : i32
    return %c0_i32, %c0_i32_0 : i32, i32
  }
  func.func @transform_4(%arg0: i32, %arg1: i32) -> (i32, i32) {
    %c0_i32 = arith.constant 0 : i32
    %c0_i32_0 = arith.constant 0 : i32
    %c0_i32_1 = arith.constant 0 : i32
    return %c0_i32, %c0_i32_0 : i32, i32
  }
  func.func @transform_5(%arg0: i32, %arg1: i32) -> (i32, i32) {
    %c0_i32 = arith.constant 0 : i32
    %c0_i32_0 = arith.constant 0 : i32
    %c0_i32_1 = arith.constant 0 : i32
    return %c0_i32, %c0_i32_0 : i32, i32
  }
  func.func @transform_6(%arg0: i32, %arg1: i32) -> (i32, i32) {
    %c0_i32 = arith.constant 0 : i32
    %c0_i32_0 = arith.constant 0 : i32
    %c0_i32_1 = arith.constant 0 : i32
    return %c0_i32, %c0_i32_0 : i32, i32
  }
  func.func @transform_7(%arg0: i32, %arg1: i32) -> (i32, i32) {
    %c0_i32 = arith.constant 0 : i32
    %c0_i32_0 = arith.constant 0 : i32
    %c0_i32_1 = arith.constant 0 : i32
    return %c0_i32, %c0_i32_0 : i32, i32
  }
  func.func @transform_8(%arg0: i32, %arg1: i32) -> (i32, i32) {
    %c0_i32 = arith.constant 0 : i32
    %c0_i32_0 = arith.constant 0 : i32
    %c0_i32_1 = arith.constant 0 : i32
    return %c0_i32, %c0_i32_0 : i32, i32
  }
  func.func @transform_9(%arg0: i32, %arg1: i32) -> (i32, i32) {
    %c0_i32 = arith.constant 0 : i32
    %c0_i32_0 = arith.constant 0 : i32
    %c0_i32_1 = arith.constant 0 : i32
    return %c0_i32, %c0_i32_0 : i32, i32
  }
  func.func @transform_10(%arg0: i32, %arg1: i32) -> (i32, i32) {
    %c0_i32 = arith.constant 0 : i32
    %c0_i32_0 = arith.constant 0 : i32
    %c0_i32_1 = arith.constant 0 : i32
    return %c0_i32, %c0_i32_0 : i32, i32
  }
  func.func @transform_11(%arg0: i32, %arg1: i32) -> (i32, i32, i32) {
    %c0_i32 = arith.constant 0 : i32
    %c0_i32_0 = arith.constant 0 : i32
    return %arg0, %arg1, %c0_i32 : i32, i32, i32
  }
}

</mosaic_0001>

<bundles_post_ra>
// kernel: tpu_custom_call.1
= control target key start
LH: loop header
LB: loop body
LE: loop exit
PB: predicated region body
PF: predicated region fallthrough
CT: control target
= control target key end

     0   :  { %s2416_s0 = inlined_call_operand.hbm [shape: bf16[2,8,32], index: 0, kind: input, shape index: {}]   ;;  %s2417_s1 = inlined_call_operand.hbm [shape: bf16[2,8,32], index: 1, kind: input, shape index: {}]   ;;  %s2418_s2 = inlined_call_operand.vmem [shape: f32[2,1,8], index: 2, kind: input, shape index: {}]   ;;  %s2419_s3 = inlined_call_operand.hbm [shape: bf16[32,32], index: 3, kind: input, shape index: {}]   ;;  %s2420_s4 = inlined_call_operand.hbm [shape: f32[1,32], index: 4, kind: input, shape index: {}]   ;;  %s2421_s5 = inlined_call_operand.vmem [shape: bf16[32,64], index: 5, kind: input, shape index: {}]   ;;  %s2422_s6 = inlined_call_operand.vmem [shape: f32[1,64], index: 6, kind: input, shape index: {}]   ;;  %s2423_s7 = inlined_call_operand.hbm [shape: bf16[32,32], index: 7, kind: input, shape index: {}]   ;;  %s2424_s8 = inlined_call_operand.vmem [shape: f32[1,32], index: 8, kind: input, shape index: {}]   ;;  %s2425_s9 = inlined_call_operand.vmem [shape: f32[1,32], index: 9, kind: input, shape index: {}]   ;;  %s2426_s10 = inlined_call_operand.vmem [shape: f32[1,32], index: 10, kind: input, shape index: {}]   ;;  %s2427_s11 = inlined_call_operand.hbm [shape: bf16[2,8,32], index: 11, kind: output, shape index: {}]  }
   0x1   :  { %2435 = sst [smem:[#allocation20_spill]] %s2418_s2 }
   0x2   :  { %2436 = sst [smem:[#allocation21_spill]] %s2419_s3 }
   0x3   :  { %2437 = sst [smem:[#allocation22_spill]] %s2420_s4 }
   0x4   :  { %2438 = sst [smem:[#allocation23_spill]] %s2423_s7 }
   0x5   :  { %2439 = sst [smem:[#allocation24_spill]] %s2424_s8 }
   0x6   :  { %2440 = sst [smem:[#allocation25_spill]] %s2425_s9 }
   0x7   :  { %2441 = sst [smem:[#allocation26_spill]] %s2426_s10 }
   0x8   :  { %2442 = sst [smem:[#allocation27_spill]] %s2427_s11 }
   0x9   :  { %16 = vsyncpa [#allocation4], 0 }
   0xa   :  { %18 = vsyncpa [#allocation4 + $0x1], 0 }
   0xb   :  { %19 = vsyncpa [#allocation7], 0 }
   0xc   :  { %21 = vsyncpa [#allocation7 + $0x1], 0 }
   0xd   :  { %22 = vsyncpa [#allocation10], 0 }
   0xe   :  { %23 = vsyncpa [#allocation5], 0 }
   0xf   :  { %25 = vsyncpa [#allocation5 + $0x1], 0  ;;  %s1993_s17 = smov 0   ;;  %s1995_s18 = smov 0  }
  0x10   :  { %s1997_s19 = smov 0   ;;  %s1999_s20 = smov 0  }
  0x11   :  { %s2001_s21 = smov 0   ;;  %s2003_s22 = smov 0  }
  0x12 LB: > { %2443 = sst [smem:[#allocation18_spill]] %s1890_s17  ;;  %s2024_s23 = sadd.s32 4294967295, %s1910_s22   ;;  %s1910_s22 = sphi %s2003_s22, %s31_s22   ;;  %s1906_s21 = sphi %s2001_s21, %s2476_s21   ;;  %s1902_s20 = sphi %s1999_s20, %s2475_s20   ;;  %s1898_s19 = sphi %s1997_s19, %s2474_s19   ;;  %s1894_s18 = sphi %s1995_s18, %s2473_s18   ;;  %s1890_s17 = sphi %s1993_s17, %s2472_s17  }
  0x13   : > { %s1392_s24 = sadd.s32 4294967294, %s1910_s22   ;;  %p65_p0 = scmp.ne.s32.totalorder %s1894_s18, %s1890_s17 }
  0x14   : > { %p2431_p1 = scmp.eq.s32.totalorder %s2024_s23, 0  ;;  %p317_p3 = scmp.eq.s32.totalorder %s1392_s24, 1 }
  0x15   : > { %p1393_p5 = scmp.ge.s32.totalorder %s1910_s22, 1  ;;  %p324_p7 = scmp.lt.s32.totalorder %s1910_s22, 3 }
  0x16   : > { %p2033_p4 = por %p2431_p1, %p65_p0  ;;  %p2038_p6 = por %p317_p3, %p65_p0 }
  0x17   : > { %p2043_p8 = pnand %p1393_p5, %p324_p7  ;;  %s1912_s28 = smov [#allocation8]  }
  0x18   : > { %s2444_s25 = scalar_select %p2033_p4, 1, 0 }
  0x19   : > { %s2445_s26 = scalar_select %p2038_p6, 1, 0 }
  0x1a   : > { %s2447_s27 = scalar_select %p2043_p8, 1, 0 }
  0x1b   : > { %2446 = sst [smem:[#allocation19_spill]] %s2445_s26  ;;  %s336_s29 = sshll.u32 %s1912_s28, 4  ;;  %s2047_s29 = int_to_ptr.vmem [resolvable:$true] %s336_s29 }
  0x1c   : > { %p1552_p9 = pneg %p2043_p8  ;;  %s1913_s12 = smov [#allocation9]  }
  0x1d   : > { %s350_s13 = sshll.u32 %s1913_s12, 4  ;;  %s1914_s14 = smov [#allocation11]   ;;  %s2058_s13 = int_to_ptr.vmem [resolvable:$true] %s350_s13 }
  0x1e   : > { %p2054_p11 = pnand %p1552_p9, %p2431_p1  ;;  %s2060_s15 = sshll.u32 %s1914_s14, 4  ;;  %s367_s15 = int_to_ptr.vmem [resolvable:$true] %s2060_s15 }
  0x1f   : > { %s2449_s3 = sld [smem:[#allocation21_spill]] }
  0x20   : > { %p2070_p13 = pneg %p2054_p11 }
  0x25   : > { %s1672_s28 = scalar_lea.hbm %s2449_s3, 256 }
  0x26   : > { %p1673_p12 = scmp.ne.s32.totalorder %s2449_s3, %s1672_s28  ;;  %p1679_p5 = scmp.lt.u32.totalorder %s1672_s28, %s2449_s3 }
  0x28   : > { %p1675_p0 = pnand %p2070_p13, %p1673_p12 }
  0x2a   : > { %p1676_p3 = pneg %p1675_p0 }
  0x2c   : > { %p1681_p7 = pnand %p1679_p5, %p1676_p3 }
  0x2e   : > { %1684 = shalt.err (!%p1681_p7)
}
  0x2f   : > { %s1685_s17 = scalar_lea.vmem %s2047_s29, 256  ;;  %p1693_p2 = scmp.lt.s32.totalorder %s2047_s29, %s2047_s29 }
  0x30   : > { %p1686_p9 = scmp.ne.s32.totalorder %s2047_s29, %s1685_s17  ;;  %p1694_p6 = scmp.lt.s32.totalorder %s1685_s17, %s1685_s17 }
  0x32   : > { %p1688_p10 = pnand %p1686_p9, %p2070_p13  ;;  %p1695_p12 = por %p1694_p6, %p1693_p2 }
  0x34   : > { %p1689_p1 = pneg %p1688_p10 }
  0x36   : > { %p1696_p0 = pnand %p1695_p12, %p1689_p1 }
  0x38   : > { %1699 = shalt.err (!%p1696_p0)
}
  0x39   : > { %s1915_s26 = smov 64   ;;  %s1916_s16 = smov 4  }
  0x3a   : > { %1555 = dma.hbm_to_vmem [thread:$0]  (!%p2054_p11), %s2449_s3, 256, %s2047_s29, [#allocation7], %s1915_s26, %s1915_s26, %s1916_s16  }
  0x3b   : > { %s2451_s4 = sld [smem:[#allocation22_spill]] }
  0x41   : > { %s1700_s17 = scalar_lea.hbm %s2451_s4, 16 }
  0x42   : > { %p1701_p1 = scmp.ne.s32.totalorder %s2451_s4, %s1700_s17  ;;  %p1707_p10 = scmp.lt.u32.totalorder %s1700_s17, %s2451_s4 }
  0x44   : > { %p1703_p2 = pnand %p1701_p1, %p2070_p13 }
  0x46   : > { %p1704_p6 = pneg %p1703_p2 }
  0x48   : > { %p1709_p3 = pnand %p1707_p10, %p1704_p6 }
  0x4a   : > { %1712 = shalt.err (!%p1709_p3)
}
  0x4b   : > { %s1713_s29 = scalar_lea.vmem %s2058_s13, 16  ;;  %s1720_s9 = scalar_lea.vmem %s2058_s13, 32 }
  0x4c   : > { %p1714_p5 = scmp.ne.s32.totalorder %s2058_s13, %s1713_s29  ;;  %p1721_p12 = scmp.lt.s32.totalorder %s2058_s13, %s2058_s13 }
  0x4d   : > { %p1722_p0 = scmp.lt.s32.totalorder %s1720_s9, %s1713_s29 }
  0x4e   : > { %p1716_p7 = pnand %p1714_p5, %p2070_p13 }
  0x4f   : > { %p1723_p1 = por %p1722_p0, %p1721_p12 }
  0x50   : > { %p1717_p9 = pneg %p1716_p7 }
  0x52   : > { %p1724_p2 = pnand %p1723_p1, %p1717_p9 }
  0x54   : > { %1727 = shalt.err (!%p1724_p2)
}
  0x55   : > { %1558 = dma.hbm_to_vmem [thread:$0]  (!%p2054_p11), %s2451_s4, 16, %s2058_s13, [#allocation10]  }
  0x56   : > { %s2452_s7 = sld [smem:[#allocation23_spill]] }
  0x5c   : > { %s1728_s28 = scalar_lea.hbm %s2452_s7, 256 }
  0x5d   : > { %p1729_p6 = scmp.ne.s32.totalorder %s2452_s7, %s1728_s28  ;;  %p1735_p5 = scmp.lt.u32.totalorder %s1728_s28, %s2452_s7 }
  0x5f   : > { %p1731_p10 = pnand %p1729_p6, %p2070_p13 }
  0x61   : > { %p1732_p3 = pneg %p1731_p10 }
  0x63   : > { %p1737_p7 = pnand %p1735_p5, %p1732_p3 }
  0x65   : > { %1740 = shalt.err (!%p1737_p7)
}
  0x66   : > { %s1741_s9 = scalar_lea.vmem %s367_s15, 256  ;;  %p1749_p1 = scmp.lt.s32.totalorder %s367_s15, %s367_s15 }
  0x67   : > { %p1742_p9 = scmp.ne.s32.totalorder %s367_s15, %s1741_s9  ;;  %p1750_p2 = scmp.lt.s32.totalorder %s1741_s9, %s1741_s9 }
  0x69   : > { %p1744_p12 = pnand %p1742_p9, %p2070_p13  ;;  %p1751_p4 = por %p1750_p2, %p1749_p1 }
  0x6b   : > { %p1745_p0 = pneg %p1744_p12 }
  0x6d   : > { %p1752_p8 = pnand %p1751_p4, %p1745_p0 }
  0x6f   : > { %1755 = shalt.err (!%p1752_p8)
}
  0x70   : > { %1561 = dma.hbm_to_vmem [thread:$0]  (!%p2054_p11), %s2452_s7, 256, %s367_s15, [#allocation10], %s1915_s26, %s1915_s26, %s1916_s16  }
  0x71   : > { %s52_s11 = sadd.s32 1, %s1898_s19  ;;  %s43_s30 = sadd.s32 1, %s1906_s21 }
  0x72   : > { %p59_p4 = scmp.ne.s32.totalorder %s1898_s19, %s1894_s18  ;;  %p45_p8 = scmp.ge.s32.totalorder %s43_s30, 2 }
  0x73   : > { %p60_p13 = scmp.eq.s32.totalorder %s1910_s22, 0  ;;  %p2453_p6 = scmp.eq.s32.totalorder %s2024_s23, 1 }
  0x74   : > { %p1576_p3 = scmp.lt.s32.totalorder %s1910_s22, 2  ;;  %s2478_s30 = smov (%p45_p8, %s43_s30), 0 }
  0x75   : > { %p2147_p10 = por %p2453_p6, %p59_p4  ;;  %p61_p5 = por %p60_p13, %p59_p4 }
  0x76   : > { %s389_s10 = sand.u32 1, %s1898_s19   ;;  %s47_s24 = ssub.s32 %s1906_s21, %s2478_s30 }
  0x77   : > { %s2454_s8 = scalar_select %p2147_p10, 1, 0 }
  0x78   : > { %p50_p11 = scmp.eq.s32.totalorder %s47_s24, 0  ;;  %s2157_s15 = sshll.u32 %s389_s10, 2 }
  0x79   : > { %s1399_s26 = sshll.u32 %s1906_s21, 6  ;;  %s393_s17 = scalar_lea.vmem [#allocation3], %s2157_s15 }
  0x7a   : > { %s2161_s16 = scalar_select %p50_p11, %s1898_s19, %s52_s11  }
  0x7b   : > { %s2166_s14 = scalar_lea.hbm %s2416_s0, %s1399_s26  ;;  %s401_s29 = sshll.u32 %s393_s17, 4  ;;  %s2169_s29 = int_to_ptr.vmem [resolvable:$true] %s401_s29 }
  0x7c   : > { %p2173_p7 = pnand %p1576_p3, %p61_p5  ;;  %s2180_s11 = scalar_lea.hbm %s2417_s1, %s1399_s26 }
  0x7d   : > { %s408_s24 = sand.u32 1, %s1910_s22   ;;  %s390_s28 = scalar_lea.sflag [#allocation4], %s389_s10 }
  0x7e   : > { %s1756_s12 = scalar_lea.hbm %s2166_s14, 64  ;;  %p1758_p12 = pneg %p2173_p7 }
  0x7f   : > { %p1757_p9 = scmp.ne.s32.totalorder %s2166_s14, %s1756_s12  ;;  %s1761_s4 = scalar_lea.hbm %s2416_s0, 128 }
  0x80   : > { %p1762_p2 = scmp.lt.u32.totalorder %s2166_s14, %s2416_s0  ;;  %p1763_p4 = scmp.lt.u32.totalorder %s1761_s4, %s1756_s12 }
  0x81   : > { %p1759_p0 = pnand %p1758_p12, %p1757_p9  ;;  %p1765_p13 = scmp.lt.u32.totalorder %s1756_s12, %s2166_s14 }
  0x82   : > { %p1764_p8 = por %p1763_p4, %p1762_p2 }
  0x83   : > { %p1760_p1 = pneg %p1759_p0 }
  0x84   : > { %p1766_p6 = por %p1765_p13, %p1764_p8 }
  0x86   : > { %p1767_p3 = pnand %p1766_p6, %p1760_p1 }
  0x88   : > { %1770 = shalt.err (!%p1767_p3)
}
  0x89   : > { %s1771_s10 = scalar_lea.vmem %s2169_s29, 64  ;;  %s1917_s3 = smov [#allocation3]  }
  0x8a   : > { %p1772_p5 = scmp.ne.s32.totalorder %s2169_s29, %s1771_s10  ;;  %s1776_s26 = sshll.u32 %s1917_s3, 4  ;;  %s1777_s26 = int_to_ptr.vmem [resolvable:$false] %s1776_s26 }
  0x8b   : > { %s1778_s7 = scalar_lea.vmem %s1777_s26, 128  ;;  %p1779_p0 = scmp.lt.s32.totalorder %s2169_s29, %s1777_s26 }
  0x8c   : > { %p1774_p11 = pnand %p1772_p5, %p1758_p12  ;;  %p1780_p2 = scmp.lt.s32.totalorder %s1778_s7, %s1771_s10 }
  0x8e   : > { %p1775_p9 = pneg %p1774_p11  ;;  %p1781_p4 = por %p1780_p2, %p1779_p0 }
  0x90   : > { %p1782_p8 = pnand %p1781_p4, %p1775_p9 }
  0x92   : > { %1785 = shalt.err (!%p1782_p8)
}
  0x93   : > { %1565 = dma.hbm_to_vmem [thread:$0]  (!%p2173_p7), %s2166_s14, 64, %s2169_s29, %s390_s28  }
  0x94   : > { %s412_s4 = scalar_lea.vmem [#allocation6], %s2157_s15  ;;  %s409_s12 = scalar_lea.sflag [#allocation7], %s408_s24 }
  0x95   : > { %s419_s2 = sshll.u32 %s412_s4, 4  ;;  %s1786_s17 = scalar_lea.hbm %s2180_s11, 64  ;;  %s420_s2 = int_to_ptr.vmem [resolvable:$true] %s419_s2 }
  0x96   : > { %p1787_p1 = scmp.ne.s32.totalorder %s2180_s11, %s1786_s17  ;;  %s1791_s3 = scalar_lea.hbm %s2417_s1, 128 }
  0x97   : > { %p1792_p3 = scmp.lt.u32.totalorder %s2180_s11, %s2417_s1  ;;  %p1793_p5 = scmp.lt.u32.totalorder %s1791_s3, %s1786_s17 }
  0x98   : > { %p1789_p13 = pnand %p1787_p1, %p1758_p12  ;;  %p1795_p9 = scmp.lt.u32.totalorder %s1786_s17, %s2180_s11 }
  0x99   : > { %p1794_p11 = por %p1793_p5, %p1792_p3 }
  0x9a   : > { %p1790_p6 = pneg %p1789_p13 }
  0x9b   : > { %p1796_p0 = por %p1795_p9, %p1794_p11 }
  0x9d   : > { %p1797_p2 = pnand %p1796_p0, %p1790_p6 }
  0x9f   : > { %1800 = shalt.err (!%p1797_p2)
}
  0xa0   : > { %s1801_s15 = scalar_lea.vmem %s420_s2, 64  ;;  %s1918_s14 = smov [#allocation6]  }
  0xa1   : > { %p1802_p4 = scmp.ne.s32.totalorder %s420_s2, %s1801_s15  ;;  %s1806_s29 = sshll.u32 %s1918_s14, 4  ;;  %s1807_s29 = int_to_ptr.vmem [resolvable:$false] %s1806_s29 }
  0xa2   : > { %s1808_s24 = scalar_lea.vmem %s1807_s29, 128  ;;  %p1809_p13 = scmp.lt.s32.totalorder %s420_s2, %s1807_s29 }
  0xa3   : > { %p1804_p8 = pnand %p1802_p4, %p1758_p12  ;;  %p1810_p10 = scmp.lt.s32.totalorder %s1808_s24, %s1801_s15 }
  0xa5   : > { %p1805_p1 = pneg %p1804_p8  ;;  %p1811_p3 = por %p1810_p10, %p1809_p13 }
  0xa7   : > { %p1812_p5 = pnand %p1811_p3, %p1805_p1 }
  0xa9   : > { %1815 = shalt.err (!%p1812_p5)
}
  0xaa   : > { %1568 = dma.hbm_to_vmem [thread:$0]  (!%p2173_p7), %s2180_s11, 64, %s420_s2, %s409_s12  }
  0xab   : > { %p2456_p6 = scmp.ne.s32.totalorder %s2447_s27, 0 }
  0xac   : > { %s2233_s28 = sand.u32 (!%p2456_p6), 1, %s1894_s18   ;;  %p2457_p10 = scmp.ne.s32.totalorder (!%p2456_p6), %s2444_s25, 0 }
  0xad   : > { %434 = sbr.rel (%p2456_p6) target bundleno = 1979 (0x7bb), region = 64  ;;  %s2236_s4 = sshll.u32 (!%p2456_p6), %s2233_s28, 2 }
  0xae   : > { %s437_s17 = scalar_lea.sflag (!%p2456_p6), [#allocation4], %s2233_s28  ;;  %s440_s13 = scalar_lea.vmem (!%p2456_p6), [#allocation3], %s2236_s4 }
  0xb4   : > { %1869 = dma.done.wait (%p2457_p10), %s437_s17, 64  }
  0xb5   : > { %1871 = vsyncadd (%p2457_p10), %s437_s17, 4294967232  ;;  %s445_s27 = sand.u32 1, %s2024_s23   ;;  %s449_s11 = scalar_lea.vmem [#allocation6], %s2236_s4 }
  0xb6   : > { %s446_s9 = scalar_lea.sflag [#allocation7], %s445_s27 }
  0xb7   : > { %1873 = dma.done.wait (%p2457_p10), %s446_s9, 64  }
  0xb8   : > { %1875 = vsyncadd (%p2457_p10), %s446_s9, 4294967232  ;;  %p2458_p7 = scmp.eq.s32.totalorder %s2024_s23, 0 }
  0xba   : > { %1877 = dma.done.wait (%p2458_p7), [#allocation7], 256   ;;  %p2459_p12 = pmov %p2458_p7 }
  0xbb   : > { %p2460_p11 = pmov %p2458_p7 }
  0xbc   : > { %1879 = vsyncadd (%p2459_p12), [#allocation7], 4294967040 }
  0xbd   : > { %1881 = dma.done.wait (%p2460_p11), [#allocation10], 272   ;;  %p2461_p9 = pmov %p2458_p7 }
  0xbe   : > { %v1919_v0 = vmov 0.0   ;;  %vm1920_vm0 = vmmov 0   ;;  %v1647_v1 = vld [vmem:[%s2421_s5] sm:$0xff]   ;;  %v1648_v2 = vld [vmem:[%s2421_s5 + $0x8] sm:$0xff]   ;;  %vm540_vm1 = vcmask 261120   ;;  %vm585_vm2 = vcmask 519168  }
  0xbf   : > { %1883 = vsyncadd (%p2461_p9), [#allocation10], 4294967024  ;;  %1462 = vmatprep.subr.bf16.mxu0 %v1919_v0  ;;  %1466 = vmatprep.mubr.msk.bf16.mxu0 %vm1920_vm0, %v1919_v0  ;;  %v1649_v3 = vld [vmem:[#allocation8] sm:$0xff]   ;;  %v1650_v4 = vld [vmem:[#allocation8 + $0x8] sm:$0xff]   ;;  %vm676_vm3 = vcmask 64512   ;;  %s1921_s26 = smov 112   ;;  %v661_v34 = vlaneseq }
  0xc0   : > { %1470 = vmatprep.subr.bf16.mxu1 %v1919_v0  ;;  %1474 = vmatprep.mubr.msk.bf16.mxu1 %vm1920_vm0, %v1919_v0  ;;  %v516_v5 = vld [vmem:[%s449_s11] sm:$0xf]  ;;  %v2276_v6 = vld [vmem:[%s440_s13] sm:$0xf]  ;;  %s1922_s7 = smov 120   ;;  %s1923_s15 = smov 104  }
  0xc1   : > { %1463 = vmatpush3.bf16.msra.mxu0 %v1647_v1  ;;  %1471 = vmatpush3.bf16.msra.mxu1 %v1649_v3  ;;  %v1409_v7 = vld [vmem:[%s2422_s6] ss:$0 sm:$0xff]  ;;  %v1413_v15 = vld [vmem:[#allocation9] ss:$0 sm:$0xff]  ;;  %p508_p0 = scmp.lt.s32.totalorder %s1902_s20, 1  ;;  %v662_v35 = vshrl.u32 %v661_v34, 7 }
  0xc2   : > { %1464 = vmatprep.subr.bf16.mxu0 %v1919_v0  ;;  %1472 = vmatprep.subr.bf16.mxu1 %v1919_v0  ;;  %v666_v36 = vand.u32 127, %v661_v34  ;;  %s2462_s17 = sld [smem:[#allocation20_spill]]  ;;  %v1924_v38 = vmov -1e+09   ;;  %s1925_s27 = smov 96   ;;  %vm743_vm5 = vcmask 1043456  }
  0xc3   : > { %s509_s14 = scalar_select %p508_p0, %s1902_s20, 1  ;;  %vm1131_vm6 = vcmask 130048   ;;  %vm1133_vm7 = vcmask 195584   ;;  %vm1234_vm8 = vcmask 257024  }
  0xc4   : > { %vm667_vm4 = vcmp.le.s32.totalorder %v666_v36, %v662_v35  ;;  %s1926_s9 = smov 80   ;;  %s1927_s11 = smov 72  }
  0xc5   : > { %1465 = vmatpush3.bf16.msra.mxu0 %v1648_v2  ;;  %1473 = vmatpush3.bf16.msra.mxu1 %v1650_v4  ;;  %v668_v39 = vsel %vm667_vm4, 0.0, %v1924_v38  ;;  %s1928_s25 = smov 88   ;;  %s1929_s2 = smov 8  }
  0xc6   : > { %1478 = vmatprep.subr.bf16.mxu0 %v1919_v0  ;;  %1484 = vmatprep.subr.bf16.mxu1 %v1919_v0  ;;  %s1930_s23 = smov 16   ;;  %s1931_s12 = smov 24  }
  0xc7   : > { %p2467_p4 = scmp.ne.s32.totalorder %s2454_s8, 0 }
  0xc8   : > { %1467 = vmatmul.mubr.msk.bf16.vlgmr.msra.gmra.mrb[0].mxu0 %vm540_vm1, %v516_v5  ;;  %1475 = vmatmul.mubr.msk.bf16.vlgmr.msra.gmra.mrb[0].mxu1 %vm540_vm1, %v2276_v6  ;;  %s510_s13 = scalar_lea.vmem %s2462_s17, %s509_s14  ;;  %s2464_s14 = sld [smem:[#allocation25_spill]] }
  0xc9   : > { %1480 = vmatprep.mubr.msk.bf16.mxu0 %vm1920_vm0, %v1919_v0  ;;  %1486 = vmatprep.mubr.msk.bf16.mxu1 %vm1920_vm0, %v1919_v0  ;;  %v1417_v37 = vld [vmem:[%s510_s13] ss:$0 sm:$0xff]  ;;  %s2465_s17 = sld [smem:[#allocation26_spill]]  ;;  %s1434_s13 = sshll.u32 %s1902_s20, 6 }
  0xca   : > { %v675_v40 = vadd.f32 %v1417_v37, %v668_v39  ;;  %s1932_s20 = smov [#allocation12]  }
 0x19b   : > { %v578_v8 = vpop.f32.mrb[0].mxu0  ;;  %v650_v14 = vpop.f32.mrb[0].mxu1 }
 0x19c   : > { %v579_v9 = vadd.f32 %v1409_v7, %v578_v8  ;;  %v1468_v10 = vpop.f32.mrb[1].mxu0  ;;  %v1476_v16 = vpop.f32.mrb[1].mxu1  ;;  %v651_v19 = vadd.f32 %v1413_v15, %v650_v14 }
 0x19d   : > { %v581_v11 = vpop.f32.mrb[2].mxu0  ;;  %v653_v17 = vpop.f32.mrb[2].mxu1 }
 0x19e   : > { %v584_v12 = vpack.c.bf16 %v579_v9, %v579_v9  ;;  %v1469_v13 = vpop.f32.mrb[3].mxu0  ;;  %v1477_v18 = vpop.f32.mrb[3].mxu1  ;;  %v656_v20 = vmul.f32 0.35355338, %v651_v19 }
 0x1a0   : > { %586 = vst.msk [vmem:[#allocation2] sm:$0xf] %vm585_vm2, %v584_v12  ;;  %v657_v24 = vpack.c.bf16 %v656_v20, %v656_v20 }
 0x1a7   : > { %v658_v21 = vld [vmem:[#allocation2] sm:$0xf] }
 0x1a8   : > { %v681_v22 = vsel %vm676_vm3, %v658_v21, 0  ;;  %v2289_v23 = vcombine.low %v658_v21, %v658_v21 }
 0x1a9   : > { %1479 = vmatpush3.bf16.xpose.msra.mxu0 %v681_v22 }
 0x1aa   : > { %900 = vrot.lane.b32.xlu1 %v2289_v23, %s1921_s26  ;;  %790 = vrot.lane.b32.xlu0 %v2289_v23, %s1922_s7 }
 0x1ab   : > { %1490 = vmatprep.subr.bf16.mxu0 %v1919_v0 }
 0x1ae   : > { %898 = vrot.lane.b32.xlu1 %v657_v24, %s1921_s26  ;;  %788 = vrot.lane.b32.xlu0 %v657_v24, %s1922_s7  ;;  %s2463_s26 = sld [smem:[#allocation24_spill]] }
 0x1b0   : > { %1481 = vmatmul.mubr.msk.bf16.vlgmr.msra.gmra.mrb[4].mxu0 %vm676_vm3, %v657_v24 }
 0x1b1   : > { %1492 = vmatprep.mubr.msk.bf16.mxu0 %vm1920_vm0, %v1919_v0 }
 0x1b2   : > { %1008 = vrot.lane.b32.xlu1 %v657_v24, %s1923_s15  ;;  %1010 = vrot.lane.b32.xlu0 %v2289_v23, %s1923_s15 }
 0x21c   : > { %v791_v25 = vpop.permute.xlu0 %790  ;;  %v901_v27 = vpop.permute.xlu1 %900 }
 0x21d   : > { %v796_v26 = vsel %vm676_vm3, %v791_v25, 0  ;;  %v906_v29 = vsel %vm676_vm3, %v901_v27, 0 }
 0x21e   : > { %1491 = vmatpush3.bf16.xpose.msra.mxu0 %v796_v26 }
 0x21f   : > { %1502 = vmatprep.subr.bf16.mxu0 %v1919_v0 }
 0x220   : > { %v789_v28 = vpop.permute.xlu0 %788  ;;  %v899_v31 = vpop.permute.xlu1 %898 }
 0x224   : > { %v1011_v30 = vpop.permute.xlu0 %1010  ;;  %v1009_v33 = vpop.permute.xlu1 %1008 }
 0x225   : > { %1493 = vmatmul.mubr.msk.bf16.vlgmr.msra.gmra.mrb[8].mxu0 %vm676_vm3, %v789_v28  ;;  %v1016_v32 = vsel %vm676_vm3, %v1011_v30, 0 }
 0x226   : > { %1503 = vmatpush3.bf16.xpose.msra.mxu0 %v906_v29  ;;  %1504 = vmatprep.mubr.msk.bf16.mxu0 %vm1920_vm0, %v1919_v0 }
 0x227   : > { %1514 = vmatprep.subr.bf16.mxu0 %v1919_v0 }
 0x22d   : > { %1505 = vmatmul.mubr.msk.bf16.vlgmr.msra.gmra.mrb[12].mxu0 %vm676_vm3, %v899_v31 }
 0x22e   : > { %1515 = vmatpush3.bf16.xpose.msra.mxu0 %v1016_v32  ;;  %1516 = vmatprep.mubr.msk.bf16.mxu0 %vm1920_vm0, %v1919_v0 }
 0x22f   : > { %1526 = vmatprep.subr.bf16.mxu0 %v1919_v0 }
 0x235   : > { %1517 = vmatmul.mubr.msk.bf16.vlgmr.msra.gmra.mrb[16].mxu0 %vm676_vm3, %v1009_v33 }
 0x236   : > { %1530 = vmatprep.mubr.msk.bf16.mxu0 %vm1920_vm0, %v1919_v0 }
 0x283   : > { %v717_v41 = vpop.f32.mrb[4].mxu0 }
 0x284   : > { %v718_v42 = vadd.f32 %v717_v41, %v675_v40  ;;  %v1482_v43 = vpop.f32.mrb[5].mxu0 }
 0x285   : > { %v720_v44 = vpop.f32.mrb[6].mxu0 }
 0x286   : > { %v1483_v45 = vpop.f32.mrb[7].mxu0  ;;  %v723_v46 = vsel %vm676_vm3, %v718_v42, -inf }
 0x287   : > { %724 = vmax.xlane.f32.xlu0 %v723_v46 }
 0x2f8   : > { %v832_v47 = vpop.f32.mrb[8].mxu0 }
 0x2f9   : > { %v833_v48 = vadd.f32 %v832_v47, %v675_v40  ;;  %v1494_v49 = vpop.f32.mrb[9].mxu0 }
 0x2fa   : > { %v835_v50 = vpop.f32.mrb[10].mxu0 }
 0x2fb   : > { %v1495_v51 = vpop.f32.mrb[11].mxu0  ;;  %v838_v52 = vsel %vm676_vm3, %v833_v48, -inf }
 0x2fc   : > { %839 = vmax.xlane.f32.xlu1 %v838_v52  ;;  %v1652_v51 = vld [vmem:[#allocation11] sm:$0xff]  }
 0x2fd   : > { %1527 = vmatpush3.bf16.msra.mxu0 %v1652_v51 }
 0x2fe   : > { %1528 = vmatprep.subr.bf16.mxu0 %v1919_v0 }
 0x300   : > { %v942_v53 = vpop.f32.mrb[12].mxu0 }
 0x301   : > { %v943_v54 = vadd.f32 %v942_v53, %v675_v40  ;;  %v1506_v55 = vpop.f32.mrb[13].mxu0 }
 0x302   : > { %v945_v56 = vpop.f32.mrb[14].mxu0 }
 0x303   : > { %v1507_v57 = vpop.f32.mrb[15].mxu0  ;;  %v948_v58 = vsel %vm676_vm3, %v943_v54, -inf  ;;  %v1653_v56 = vld [vmem:[#allocation11 + $0x8] sm:$0xff]  }
 0x304   : > { %949 = vmax.xlane.f32.xlu0 %v948_v58  ;;  %1529 = vmatpush3.bf16.msra.mxu0 %v1653_v56 }
 0x308   : > { %v1052_v59 = vpop.f32.mrb[16].mxu0 }
 0x309   : > { %v1053_v60 = vadd.f32 %v1052_v59, %v675_v40  ;;  %v1518_v61 = vpop.f32.mrb[17].mxu0 }
 0x30a   : > { %v1055_v62 = vpop.f32.mrb[18].mxu0 }
 0x30b   : > { %v1519_v63 = vpop.f32.mrb[19].mxu0  ;;  %v1058_v1 = vsel %vm676_vm3, %v1053_v60, -inf }
 0x30c   : > { %1059 = vmax.xlane.f32.xlu0 %v1058_v1 }
 0x314   : > { %v725_v2 = vpop.xlane.xlu0 %724 }
 0x315   : > { %v726_v3 = vsub.f32 %v718_v42, %v725_v2 }
 0x317   : > { %v727_v4 = vmul.f32 1.442695, %v726_v3 }
 0x319   : > { %1654 = vpow2.f32 %v727_v4 }
 0x323   : > { %v1655_v5 = vpop.eup %1654 }
 0x324   : > { %v729_v7 = vsel %vm676_vm3, %v1655_v5, 0.0 }
 0x325   : > { %730 = vadd.xlane.f32.xlu1 %v729_v7 }
 0x336   : > { %738 = vrot.lane.b32.xlu1 %v2289_v23, %s1925_s27  ;;  %s507_s27 = scalar_lea.vmem [#allocation12], %s2236_s4  ;;  %s1820_s4 = sshll.u32 %s1932_s20, 4  ;;  %s1821_s4 = int_to_ptr.vmem [resolvable:$false] %s1820_s4 }
 0x337   : > { %s1822_s3 = scalar_lea.vmem %s1821_s4, 128 }
 0x389   : > { %v840_v8 = vpop.xlane.xlu1 %839 }
 0x38a   : > { %v841_v9 = vsub.f32 %v833_v48, %v840_v8 }
 0x38c   : > { %v842_v10 = vmul.f32 1.442695, %v841_v9  ;;  %v1427_v9 = vld [vmem:[%s2463_s26] ss:$0 sm:$0xff] }
 0x38e   : > { %1656 = vpow2.f32 %v842_v10  ;;  %v588_v10 = vunpack.c.l.bf16 %v2276_v6 }
 0x391   : > { %v950_v11 = vpop.xlane.xlu0 %949 }
 0x392   : > { %v951_v12 = vsub.f32 %v943_v54, %v950_v11 }
 0x394   : > { %v952_v13 = vmul.f32 1.442695, %v951_v12 }
 0x396   : > { %1658 = vpow2.f32 %v952_v13 }
 0x398   : > { %v1657_v14 = vpop.eup %1656 }
 0x399   : > { %v1060_v15 = vpop.xlane.xlu0 %1059  ;;  %v844_v16 = vsel %vm676_vm3, %v1657_v14, 0.0 }
 0x39a   : > { %v1061_v17 = vsub.f32 %v1053_v60, %v1060_v15  ;;  %845 = vadd.xlane.f32.xlu0 %v844_v16 }
 0x39c   : > { %v1062_v18 = vmul.f32 1.442695, %v1061_v17 }
 0x39e   : > { %1660 = vpow2.f32 %v1062_v18 }
 0x3a0   : > { %v1659_v19 = vpop.eup %1658 }
 0x3a1   : > { %v954_v20 = vsel %vm676_vm3, %v1659_v19, 0.0 }
 0x3a2   : > { %955 = vadd.xlane.f32.xlu1 %v954_v20 }
 0x3a8   : > { %v1661_v21 = vpop.eup %1660 }
 0x3a9   : > { %v1064_v22 = vsel %vm676_vm3, %v1661_v21, 0.0 }
 0x3aa   : > { %1065 = vadd.xlane.f32.xlu0 %v1064_v22 }
 0x3b2   : > { %v731_v24 = vpop.xlane.xlu1 %730 }
 0x3b3   : > { %1662 = vrcp.f32 %v731_v24  ;;  %960 = vrot.lane.b32.xlu1 %v2289_v23, %s1926_s9  ;;  %s1251_s9 = sshll.u32 %s507_s27, 4  ;;  %s2369_s9 = int_to_ptr.vmem [resolvable:$true] %s1251_s9 }
 0x3b4   : > { %s1816_s10 = scalar_lea.vmem %s2369_s9, 64  ;;  %p1823_p13 = scmp.lt.s32.totalorder %s2369_s9, %s1821_s4 }
 0x3b5   : > { %p1817_p2 = scmp.ne.s32.totalorder %s2369_s9, %s1816_s10  ;;  %p1824_p3 = scmp.lt.s32.totalorder %s1822_s3, %s1816_s10 }
 0x3b6   : > { %v739_v25 = vpop.permute.xlu1 %738 }
 0x3b7   : > { %v745_v26 = vsel %vm743_vm5, %v739_v25, 0  ;;  %1070 = vrot.lane.b32.xlu1 %v2289_v23, %s1927_s11  ;;  %p1818_p8 = pnand %p1817_p2, %p2467_p4  ;;  %p1825_p5 = por %p1824_p3, %p1823_p13 }
 0x3b8   : > { %1485 = vmatpush3.bf16.msra.mxu1 %v745_v26 }
 0x3b9   : > { %1496 = vmatprep.subr.bf16.mxu1 %v1919_v0  ;;  %p1819_p1 = pneg %p1818_p8 }
 0x3bb   : > { %p1826_p6 = pnand %p1825_p5, %p1819_p1 }
 0x3bd   : > { %v1663_v27 = vpop.eup %1662 }
 0x3be   : > { %v733_v28 = vmul.f32 %v1663_v27, %v1655_v5  ;;  %v1431_v27 = vld [vmem:[%s2464_s14] ss:$0 sm:$0xff] }
 0x3c0   : > { %850 = vrot.lane.b32.xlu0 %v2289_v23, %s1928_s25  ;;  %v734_v29 = vpack.c.bf16 %v733_v28, %v733_v28 }
 0x3c2   : > { %1487 = vmatmul.mubr.msk.bf16.vlgmr.msra.gmra.mrb[4].mxu1 %vm676_vm3, %v734_v29  ;;  %v1432_v29 = vld [vmem:[%s2465_s17] ss:$0 sm:$0xff] }
 0x3c3   : > { %1498 = vmatprep.mubr.msk.bf16.mxu1 %vm1920_vm0, %v1919_v0 }
 0x427   : > { %v846_v30 = vpop.xlane.xlu0 %845 }
 0x428   : > { %1664 = vrcp.f32 %v846_v30 }
 0x42f   : > { %v956_v31 = vpop.xlane.xlu1 %955 }
 0x430   : > { %1666 = vrcp.f32 %v956_v31 }
 0x432   : > { %v1665_v32 = vpop.eup %1664 }
 0x433   : > { %v848_v34 = vmul.f32 %v1665_v32, %v1657_v14  ;;  %v961_v37 = vpop.permute.xlu1 %960 }
 0x434   : > { %v966_v39 = vsel %vm743_vm5, %v961_v37, 0 }
 0x435   : > { %v849_v23 = vpack.c.bf16 %v848_v34, %v848_v34 }
 0x437   : > { %v1066_v33 = vpop.xlane.xlu0 %1065  ;;  %v1071_v41 = vpop.permute.xlu1 %1070 }
 0x438   : > { %1668 = vrcp.f32 %v1066_v33  ;;  %v1076_v44 = vsel %vm743_vm5, %v1071_v41, 0 }
 0x43a   : > { %v1667_v38 = vpop.eup %1666 }
 0x43b   : > { %v851_v35 = vpop.permute.xlu0 %850  ;;  %v958_v40 = vmul.f32 %v1667_v38, %v1659_v19 }
 0x43c   : > { %v856_v36 = vsel %vm743_vm5, %v851_v35, 0 }
 0x43d   : > { %1497 = vmatpush3.bf16.msra.mxu1 %v856_v36  ;;  %v959_v42 = vpack.c.bf16 %v958_v40, %v958_v40 }
 0x43e   : > { %1508 = vmatprep.subr.bf16.mxu1 %v1919_v0 }
 0x440   : > { %1499 = vmatmul.mubr.msk.bf16.vlgmr.msra.gmra.mrb[8].mxu1 %vm676_vm3, %v849_v23 }
 0x441   : > { %1509 = vmatpush3.bf16.msra.mxu1 %v966_v39  ;;  %1510 = vmatprep.mubr.msk.bf16.mxu1 %vm1920_vm0, %v1919_v0 }
 0x442   : > { %1520 = vmatprep.subr.bf16.mxu1 %v1919_v0  ;;  %v1669_v43 = vpop.eup %1668 }
 0x443   : > { %v1068_v45 = vmul.f32 %v1669_v43, %v1661_v21 }
 0x445   : > { %v1069_v46 = vpack.c.bf16 %v1068_v45, %v1068_v45 }
 0x448   : > { %1511 = vmatmul.mubr.msk.bf16.vlgmr.msra.gmra.mrb[12].mxu1 %vm676_vm3, %v959_v42 }
 0x449   : > { %1521 = vmatpush3.bf16.msra.mxu1 %v1076_v44  ;;  %1522 = vmatprep.mubr.msk.bf16.mxu1 %vm1920_vm0, %v1919_v0 }
 0x450   : > { %1523 = vmatmul.mubr.msk.bf16.vlgmr.msra.gmra.mrb[16].mxu1 %vm676_vm3, %v1069_v46 }
 0x495   : > { %v781_v47 = vpop.f32.mrb[4].mxu1 }
 0x496   : > { %v1488_v48 = vpop.f32.mrb[5].mxu1 }
 0x497   : > { %v784_v49 = vpop.f32.mrb[6].mxu1 }
 0x498   : > { %v1489_v50 = vpop.f32.mrb[7].mxu1 }
 0x513   : > { %v892_v52 = vpop.f32.mrb[8].mxu1 }
 0x514   : > { %1119 = vrot.lane.b32.xlu0 %v892_v52, %s1929_s2  ;;  %v1500_v53 = vpop.f32.mrb[9].mxu1  ;;  %s2466_s2 = sld [smem:[#allocation27_spill]] }
 0x515   : > { %v895_v54 = vpop.f32.mrb[10].mxu1 }
 0x516   : > { %v1501_v55 = vpop.f32.mrb[11].mxu1 }
 0x51b   : > { %v1002_v57 = vpop.f32.mrb[12].mxu1 }
 0x51c   : > { %1123 = vrot.lane.b32.xlu1 %v1002_v57, %s1930_s23  ;;  %v1512_v58 = vpop.f32.mrb[13].mxu1  ;;  %s2367_s23 = scalar_lea.hbm %s2466_s2, %s1434_s13 }
 0x51d   : > { %v1005_v59 = vpop.f32.mrb[14].mxu1 }
 0x51e   : > { %v1513_v60 = vpop.f32.mrb[15].mxu1 }
 0x523   : > { %v1112_v61 = vpop.f32.mrb[16].mxu1 }
 0x524   : > { %1127 = vrot.lane.b32.xlu0 %v1112_v61, %s1931_s12  ;;  %v1524_v62 = vpop.f32.mrb[17].mxu1  ;;  %s1237_s12 = scalar_lea.sflag [#allocation5], %s2233_s28 }
 0x525   : > { %v1115_v63 = vpop.f32.mrb[18].mxu1 }
 0x526   : > { %v1525_v0 = vpop.f32.mrb[19].mxu1 }
 0x586   : > { %v1120_v1 = vpop.permute.xlu0 %1119 }
 0x587   : > { %v1130_v3 = vsel %vm676_vm3, %v781_v47, %v1120_v1 }
 0x58e   : > { %v1124_v2 = vpop.permute.xlu1 %1123 }
 0x58f   : > { %v1132_v4 = vsel %vm1131_vm6, %v1130_v3, %v1124_v2 }
 0x596   : > { %v1128_v5 = vpop.permute.xlu0 %1127 }
 0x597   : > { %v1134_v7 = vsel %vm1133_vm7, %v1132_v4, %v1128_v5 }
 0x598   : > { %v1135_v8 = vpack.c.bf16 %v1134_v7, %v1134_v7 }
 0x59a   : > { %1531 = vmatmul.mubr.msk.bf16.vlgmr.msra.gmra.mrb[20].mxu0 %vm540_vm1, %v1135_v8 }
 0x66d   : > { %v1196_v11 = vpop.f32.mrb[20].mxu0 }
 0x66e   : > { %v1197_v12 = vadd.f32 %v1427_v9, %v1196_v11  ;;  %v1532_v13 = vpop.f32.mrb[21].mxu0 }
 0x66f   : > { %v1199_v14 = vpop.f32.mrb[22].mxu0 }
 0x670   : > { %v1533_v15 = vpop.f32.mrb[23].mxu0  ;;  %v1202_v16 = vadd.f32 %v1197_v12, %v588_v10 }
 0x672   : > { %v1203_v17 = vsel %vm540_vm1, %v1202_v16, 0.0 }
 0x673   : > { %1204 = vadd.xlane.f32.xlu1 %v1203_v17 }
 0x700   : > { %v1205_v18 = vpop.xlane.xlu1 %1204 }
 0x701   : > { %v1207_v19 = vmul.f32 0.03125, %v1205_v18 }
 0x703   : > { %v1208_v20 = vsub.f32 %v1202_v16, %v1207_v19 }
 0x705   : > { %v1209_v21 = vmul.f32 %v1208_v20, %v1208_v20 }
 0x707   : > { %v1210_v22 = vsel %vm540_vm1, %v1209_v21, 0.0 }
 0x708   : > { %1211 = vadd.xlane.f32.xlu0 %v1210_v22 }
 0x795   : > { %v1212_v24 = vpop.xlane.xlu0 %1211 }
 0x796   : > { %v1213_v6 = vmul.f32 0.03125, %v1212_v24 }
 0x798   : > { %v1214_v25 = vadd.f32 1e-05, %v1213_v6 }
 0x79a   : > { %1670 = vrsqrt.f32 %v1214_v25 }
 0x7a4   : > { %v1671_v26 = vpop.eup %1670 }
 0x7a5   : > { %v1216_v28 = vmul.f32 %v1671_v26, %v1208_v20 }
 0x7a7   : > { %v1224_v30 = vmul.f32 %v1431_v27, %v1216_v28 }
 0x7a9   : > { %v1232_v31 = vadd.f32 %v1432_v29, %v1224_v30 }
 0x7ab   : > { %v1233_v32 = vpack.c.bf16 %v1232_v31, %v1232_v31 }
 0x7ad   : > { %1235 = vst.msk [vmem:[%s507_s27] sm:$0xf] %vm1234_vm8, %v1233_v32 }
 0x7ae   : > { %1829 = shalt.err (!%p1826_p6)
}
 0x7af   : > { %s1830_s28 = scalar_lea.hbm %s2367_s23, 64  ;;  %s1834_s15 = scalar_lea.hbm %s2466_s2, 128 }
 0x7b0   : > { %p1831_p10 = scmp.ne.s32.totalorder %s2367_s23, %s1830_s28  ;;  %p1835_p11 = scmp.lt.u32.totalorder %s2367_s23, %s2466_s2 }
 0x7b1   : > { %p1836_p9 = scmp.lt.u32.totalorder %s1834_s15, %s1830_s28  ;;  %p1838_p2 = scmp.lt.u32.totalorder %s1830_s28, %s2367_s23 }
 0x7b2   : > { %p1832_p7 = pnand %p1831_p10, %p2467_p4 }
 0x7b3   : > { %p1837_p0 = por %p1836_p9, %p1835_p11 }
 0x7b4   : > { %p1833_p12 = pneg %p1832_p7 }
 0x7b5   : > { %p1839_p8 = por %p1838_p2, %p1837_p0 }
 0x7b7   : > { %p1840_p1 = pnand %p1839_p8, %p1833_p12 }
 0x7b9   : > { %1843 = shalt.err (!%p1840_p1)
}
 0x7ba   : > { %1550 = dma.vmem_to_hbm [thread:$0]  (%p2467_p4), %s2369_s9, 64, %s2367_s23, %s1237_s12  }
 0x7bb PF: > { %s2468_s24 = sld [smem:[#allocation18_spill]]  ;;  %s2469_s17 = sld [smem:[#allocation19_spill]] }
 0x7bc   : > { %p2471_p3 = scmp.ge.s32.totalorder %s1910_s22, 2 }
 0x7c1   : > { %s1263_s13 = sand.u32 1, %s2468_s24   ;;  %p2470_p13 = scmp.ne.s32.totalorder %s2469_s17, 0 }
 0x7c2   : > { %s1264_s27 = scalar_lea.sflag [#allocation5], %s1263_s13 }
 0x7c3   : > { %p1570_p5 = pnand %p2471_p3, %p2470_p13 }
 0x7c5   : > { %1885 = dma.done.wait (!%p1570_p5), %s1264_s27, 64  }
 0x7c6   : > { %1887 = vsyncadd (!%p1570_p5), %s1264_s27, 4294967232  ;;  %s31_s22 = sadd.s32 1, %s1910_s22   ;;  %s2472_s17 = smov %s1894_s18 }
 0x7c7   : > { %p28_p6 = scmp.ge.s32.totalorder %s31_s22, 4   ;;  %s2473_s18 = smov %s1898_s19 }
 0x7c8   : > { %s2474_s19 = smov %s2161_s16  ;;  %s2475_s20 = smov %s1906_s21 }
 0x7c9   : > { %s2476_s21 = smov %s2478_s30  ;;  %30 = sbr.rel (!%p28_p6) target bundleno = 18 (0x12), region = 141 }
 0x7d0   :  { %1269 = vsyncpa [#allocation4], 1 }
 0x7d1   :  { %1271 = vsyncpa [#allocation4 + $0x1], 1 }
 0x7d2   :  { %1272 = vsyncpa [#allocation7], 1 }
 0x7d3   :  { %1274 = vsyncpa [#allocation7 + $0x1], 1 }
 0x7d4   :  { %1275 = vsyncpa [#allocation10], 1 }
 0x7d5   :  { %1276 = vsyncpa [#allocation5], 1 }
 0x7d6   :  { %1278 = vsyncpa [#allocation5 + $0x1], 1 }

</bundles_post_ra>
